<compile_context>
chip_gen: v5e
topology: v5e:2x2
jax: 0.10.0
libtpu: 0.0.40
codegen_flags: <defaults>
</compile_context>

<pallas_src>
import functools

import jax
import jax.numpy as jnp
import numpy as np
from jax.experimental import pallas as pl
from jax.experimental.pallas import tpu as pltpu


def _round_up(x, m):
    return (x + m - 1) // m * m


M1_PAD = 176   # 13*13 = 169 conv1 output positions, padded to a multiple of 8
K1_PAD = 16    # 3*3*1 = 9 conv1 patch columns, padded
M2 = 36        # 6*6 conv2 output positions (per sample)
M3 = 4         # 2*2 conv3 output positions (per sample)


# ------------------------------ Pallas kernel ------------------------------ #

def _fused_forward_kernel(p1_ref, w1_ref, b1_ref,
                          s2_ref, w2_ref, b2_ref,
                          s3_ref, w3_ref, b3_ref,
                          wfc_ref, bfc_ref, wh_ref, bh_ref,
                          out_ref, *, fc_size, num_outputs, out_lanes):
    """One sample per grid step; every intermediate stays in VMEM / vregs."""
    f32 = jnp.float32
    bf16 = jnp.bfloat16
    dot = functools.partial(jnp.dot, preferred_element_type=f32)

    # ---- conv1: single matmul on pre-extracted (176, 16) patches ---------- #
    y1 = jnp.maximum(dot(p1_ref[0], w1_ref[...]) + b1_ref[...], 0.0)
    y1 = y1.astype(bf16)                                             # (176, 32)
    # NOTE: padded rows 169..175 hold relu(b1) != 0; s2 never selects them.

    # ---- conv2: 9 batch-independent one-hot gathers -> lane concat ->
    #      one K=288 im2col matmul ------------------------------------------ #
    patches2 = jnp.concatenate(
        [dot(s2_ref[t], y1).astype(bf16) for t in range(9)], axis=1)  # (36, 288)
    y2 = jnp.maximum(dot(patches2, w2_ref[...]) + b2_ref[...], 0.0)
    y2 = y2.astype(bf16)                                             # (36, 64)

    # ---- conv3: same pattern, one K=576 matmul ----------------------------- #
    patches3 = jnp.concatenate(
        [dot(s3_ref[t], y2).astype(bf16) for t in range(9)], axis=1)  # (4, 576)
    y3 = jnp.maximum(dot(patches3, w3_ref[...]) + b3_ref[...], 0.0)   # (4, 64)

    # ---- fc_1: pack 4 spatial x 64 ch along lanes -> one K=256 matmul ------ #
    flat = jnp.concatenate([y3[s:s + 1, :] for s in range(M3)], axis=1)  # (1,256)
    feats = jnp.maximum(dot(flat.astype(bf16), wfc_ref[...]) + bfc_ref[...], 0.0)

    # ---- merged action + value heads --------------------------------------- #
    heads = dot(feats.astype(bf16), wh_ref[...]) + bh_ref[...]       # (1, no+1)

    # ---- single lane-dense store: [feats | action | value | 0-pad] --------- #
    pad = out_lanes - (fc_size + num_outputs + 1)
    row = jnp.concatenate([feats, heads, jnp.zeros((1, pad), f32)], axis=1)
    out_ref[0] = row                                                 # (1, 128)


# ------------------------------- Glue (JAX) -------------------------------- #

def _extract_conv1_patches(obs):
    """obs (B, 784) -> per-sample conv1 im2col patches (B, 176, 16), bf16."""
    B = obs.shape[0]
    x = obs.reshape(B, 28, 28).astype(jnp.float32)
    cols = []
    for ky in range(3):
        for kx in range(3):
            cols.append(x[:, ky:ky + 25:2, kx:kx + 25:2])            # (B, 13, 13)
    p = jnp.stack(cols, axis=-1).reshape(B, 169, 9)
    p = jnp.pad(p, ((0, 0), (0, M1_PAD - 169), (0, K1_PAD - 9)))
    return p.astype(jnp.bfloat16)
    # TODO(synk): conv1 im2col could move into the kernel via strided pl.ds
    #             loads; kept as a tiny XLA prelude (bf16, ~5.5 KB/sample).


def forward(obs, packed):
    """Returns (action_out, features, value) — module.forward + value_function."""
    B = obs.shape[0]
    fc_size = packed["wfc"].shape[1]
    num_outputs = packed["wh"].shape[1] - 1
    out_lanes = max(128, _round_up(fc_size + num_outputs + 1, 128))

    p1 = _extract_conv1_patches(obs)

    const2 = lambda shape: pl.BlockSpec(shape, lambda b: (0, 0))
    const3 = lambda shape: pl.BlockSpec(shape, lambda b: (0, 0, 0))

    kernel = functools.partial(_fused_forward_kernel, fc_size=fc_size,
                               num_outputs=num_outputs, out_lanes=out_lanes)

    out = pl.pallas_call(
        kernel,
        grid=(B,),
        out_shape=jax.ShapeDtypeStruct((B, 1, out_lanes), jnp.float32),
        in_specs=[
            pl.BlockSpec((1, M1_PAD, K1_PAD), lambda b: (b, 0, 0)),  # p1 (streamed)
            const2((K1_PAD, 32)),                                    # w1 (resident)
            const2((1, 32)),                                         # b1
            const3((9, M2, M1_PAD)),                                 # s2
            const2((9 * 32, 64)),                                    # w2
            const2((1, 64)),                                         # b2
            const3((9, M3, M2)),                                     # s3
            const2((9 * 64, 64)),                                    # w3
            const2((1, 64)),                                         # b3
            const2((4 * 64, fc_size)),                               # wfc
            const2((1, fc_size)),                                    # bfc
            const2((fc_size, num_outputs + 1)),                      # wh
            const2((1, num_outputs + 1)),                            # bh
        ],
        out_specs=pl.BlockSpec((1, 1, out_lanes), lambda b: (b, 0, 0)),
        compiler_params=pltpu.CompilerParams(
            dimension_semantics=("parallel",)),
    )(p1, packed["w1"], packed["b1"],
      packed["s2"], packed["w2"], packed["b2"],
      packed["s3"], packed["w3"], packed["b3"],
      packed["wfc"], packed["bfc"], packed["wh"], packed["bh"])

    out = out.reshape(B, out_lanes)
    features = out[:, :fc_size]
    action_out = out[:, fc_size:fc_size + num_outputs]
    value = out[:, fc_size + num_outputs]
    return action_out, features, value


# -------------------- constant packing (done once, numpy) ------------------ #

def _sel2():
    """Conv2 one-hot gathers over y1's 13x13 grid (rows padded to 176)."""
    S = np.zeros((9, M2, M1_PAD), np.float32)
    for t in range(9):
        ky, kx = divmod(t, 3)
        for oh in range(6):
            for ow in range(6):
                S[t, oh * 6 + ow, (2 * oh + ky) * 13 + (2 * ow + kx)] = 1.0
    return S


def _sel3():
    """Conv3 one-hot gathers over y2's 6x6 grid."""
    S = np.zeros((9, M3, M2), np.float32)
    for t in range(9):
        ky, kx = divmod(t, 3)
        for oh in range(2):
            for ow in range(2):
                S[t, oh * 2 + ow, (2 * oh + ky) * 6 + (2 * ow + kx)] = 1.0
    return S


def pack_params(params):
    bf16, f32 = jnp.bfloat16, jnp.float32

    w1 = np.zeros((K1_PAD, 32), np.float32)                  # pad K 9 -> 16
    w1[:9, :] = np.asarray(params["conv1_w"], np.float32).reshape(9, 32)

    w2 = np.asarray(params["conv2_w"], np.float32).reshape(9 * 32, 64)
    w3 = np.asarray(params["conv3_w"], np.float32).reshape(9 * 64, 64)

    # fc_1: our flat layout is spatial*64 + channel; torch's NCHW flatten is
    # channel*4 + spatial -> permute rows once offline.
    fc1_w = np.asarray(params["fc1_w"], np.float32)          # (256, fc)
    idx = np.arange(256)
    s, c = idx // 64, idx % 64
    wfc = fc1_w[c * 4 + s, :]

    wh = np.concatenate([np.asarray(params["act_w"], np.float32),
                         np.asarray(params["val_w"], np.float32)], axis=1)
    bh = np.concatenate([np.asarray(params["act_b"], np.float32),
                         np.asarray(params["val_b"], np.float32)])

    j = jnp.asarray
    return {
        "w1": j(w1, dtype=bf16),
        "b1": j(params["conv1_b"], dtype=f32).reshape(1, -1),
        "s2": j(_sel2(), dtype=bf16),
        "w2": j(w2, dtype=bf16),
        "b2": j(params["conv2_b"], dtype=f32).reshape(1, -1),
        "s3": j(_sel3(), dtype=bf16),
        "w3": j(w3, dtype=bf16),
        "b3": j(params["conv3_b"], dtype=f32).reshape(1, -1),
        "wfc": j(wfc, dtype=bf16),
        "bfc": j(params["fc1_b"], dtype=f32).reshape(1, -1),
        "wh": j(wh, dtype=bf16),
        "bh": j(bh, dtype=f32).reshape(1, -1),
    }


# ----------------------- deterministic parameter init ---------------------- #

def init_params(key, num_outputs=10, fc_size=32):
    ks = jax.random.split(key, 12)

    def u(k, shape, fan_in):
        bound = 1.0 / np.sqrt(fan_in)
        return jax.random.uniform(k, shape, jnp.float32, -bound, bound)

    return {
        # conv weights stored as (kh, kw, Cin, Cout)
        "conv1_w": u(ks[0], (3, 3, 1, 32), 9 * 1),
        "conv1_b": u(ks[1], (32,), 9 * 1),
        "conv2_w": u(ks[2], (3, 3, 32, 64), 9 * 32),
        "conv2_b": u(ks[3], (64,), 9 * 32),
        "conv3_w": u(ks[4], (3, 3, 64, 64), 9 * 64),
        "conv3_b": u(ks[5], (64,), 9 * 64),
        "fc1_w":   u(ks[6], (256, fc_size), 256),
        "fc1_b":   u(ks[7], (fc_size,), 256),
        "act_w":   u(ks[8], (fc_size, num_outputs), fc_size),
        "act_b":   u(ks[9], (num_outputs,), fc_size),
        "val_w":   u(ks[10], (fc_size, 1), fc_size),
        "val_b":   u(ks[11], (1,), fc_size),
    }


# ------------------------- pure-JAX reference check ------------------------ #

def reference_forward(obs, params):
    B = obs.shape[0]
    x = obs.reshape(B, 28, 28, 1).astype(jnp.float32)
    x = jnp.transpose(x, (0, 3, 1, 2))                       # NCHW

    def conv(x, w, b):
        w_oihw = jnp.transpose(w, (3, 2, 0, 1))
        y = jax.lax.conv_general_dilated(
            x, w_oihw, window_strides=(2, 2), padding="VALID",
            dimension_numbers=("NCHW", "OIHW", "NCHW"),
            precision=jax.lax.Precision.HIGHEST)
        return jax.nn.relu(y + b.reshape(1, -1, 1, 1))

    x = conv(x, params["conv1_w"], params["conv1_b"])
    x = conv(x, params["conv2_w"], params["conv2_b"])
    x = conv(x, params["conv3_w"], params["conv3_b"])
    feat_in = x.reshape(B, -1)
    hi = jax.lax.Precision.HIGHEST
    features = jax.nn.relu(
        jnp.dot(feat_in, params["fc1_w"], precision=hi) + params["fc1_b"])
    action = jnp.dot(features, params["act_w"], precision=hi) + params["act_b"]
    value = (jnp.dot(features, params["val_w"], precision=hi)
             + params["val_b"]).reshape(-1)
    return action, features, value


# ----------------------------------- main ----------------------------------- #

if __name__ == "__main__":
    B, NUM_OUTPUTS, FC_SIZE = 2, 10, 32
    key = jax.random.PRNGKey(0)
    k_obs, k_par = jax.random.split(key)

    obs = jax.random.uniform(k_obs, (B, 28 * 28), jnp.float32)   # (2, 784)
    params = init_params(k_par, num_outputs=NUM_OUTPUTS, fc_size=FC_SIZE)
    packed = pack_params(params)

    action_out, features, value = jax.jit(forward)(obs, packed)
    jax.block_until_ready((action_out, features, value))

    ref_action, ref_features, ref_value = reference_forward(obs, params)
    assert action_out.shape == (B, NUM_OUTPUTS)
    assert features.shape == (B, FC_SIZE)
    assert value.shape == (B,)
    # bf16 matmul operands with f32 accumulation (per perf guidance) -> 1e-2
    # tolerance against the HIGHEST-precision f32 reference.
    np.testing.assert_allclose(np.asarray(action_out), np.asarray(ref_action),
                               rtol=1e-2, atol=1e-2)
    np.testing.assert_allclose(np.asarray(features), np.asarray(ref_features),
                               rtol=1e-2, atol=1e-2)
    np.testing.assert_allclose(np.asarray(value), np.asarray(ref_value),
                               rtol=1e-2, atol=1e-2)

    print("KERNEL_OK")
</pallas_src>

<mosaic_0001>
module attributes {stable_mosaic.version = 11 : i64} {
  func.func @_fused_forward_kernel(%arg0: i32, %arg1: memref<1x176x16xbf16, #tpu.memory_space<vmem>>, %arg2: memref<16x32xbf16, #tpu.memory_space<vmem>>, %arg3: memref<1x32xf32, #tpu.memory_space<vmem>>, %arg4: memref<9x36x176xbf16, #tpu.memory_space<vmem>>, %arg5: memref<288x64xbf16, #tpu.memory_space<vmem>>, %arg6: memref<1x64xf32, #tpu.memory_space<vmem>>, %arg7: memref<9x4x36xbf16, #tpu.memory_space<vmem>>, %arg8: memref<576x64xbf16, #tpu.memory_space<vmem>>, %arg9: memref<1x64xf32, #tpu.memory_space<vmem>>, %arg10: memref<256x32xbf16, #tpu.memory_space<vmem>>, %arg11: memref<1x32xf32, #tpu.memory_space<vmem>>, %arg12: memref<32x11xbf16, #tpu.memory_space<vmem>>, %arg13: memref<1x11xf32, #tpu.memory_space<vmem>>, %arg14: memref<1x1x128xf32, #tpu.memory_space<vmem>>) attributes {dimension_semantics = [#tpu.dimension_semantics<parallel>], iteration_bounds = array<i64: 2>, scalar_prefetch = 0 : i64, scratch_operands = 0 : i64, tpu.core_type = #tpu.core_type<tc>, window_params = [{transform_indices = @transform_0, window_bounds = array<i64: 1, 176, 16>}, {pipeline_mode = #tpu.pipeline_mode<synchronous>, transform_indices = @transform_1, window_bounds = array<i64: 16, 32>}, {pipeline_mode = #tpu.pipeline_mode<synchronous>, transform_indices = @transform_2, window_bounds = array<i64: 1, 32>}, {pipeline_mode = #tpu.pipeline_mode<synchronous>, transform_indices = @transform_3, window_bounds = array<i64: 9, 36, 176>}, {pipeline_mode = #tpu.pipeline_mode<synchronous>, transform_indices = @transform_4, window_bounds = array<i64: 288, 64>}, {pipeline_mode = #tpu.pipeline_mode<synchronous>, transform_indices = @transform_5, window_bounds = array<i64: 1, 64>}, {pipeline_mode = #tpu.pipeline_mode<synchronous>, transform_indices = @transform_6, window_bounds = array<i64: 9, 4, 36>}, {pipeline_mode = #tpu.pipeline_mode<synchronous>, transform_indices = @transform_7, window_bounds = array<i64: 576, 64>}, {pipeline_mode = #tpu.pipeline_mode<synchronous>, transform_indices = @transform_8, window_bounds = array<i64: 1, 64>}, {pipeline_mode = #tpu.pipeline_mode<synchronous>, transform_indices = @transform_9, window_bounds = array<i64: 256, 32>}, {pipeline_mode = #tpu.pipeline_mode<synchronous>, transform_indices = @transform_10, window_bounds = array<i64: 1, 32>}, {pipeline_mode = #tpu.pipeline_mode<synchronous>, transform_indices = @transform_11, window_bounds = array<i64: 32, 11>}, {pipeline_mode = #tpu.pipeline_mode<synchronous>, transform_indices = @transform_12, window_bounds = array<i64: 1, 11>}, {transform_indices = @transform_13, window_bounds = array<i64: 1, 1, 128>}]} {
    %c0 = arith.constant 0 : index
    %c0_0 = arith.constant 0 : index
    %c0_1 = arith.constant 0 : index
    %0 = vector.load %arg1[%c0, %c0_0, %c0_1] : memref<1x176x16xbf16, #tpu.memory_space<vmem>>, vector<1x176x16xbf16>
    %1 = vector.shape_cast %0 : vector<1x176x16xbf16> to vector<176x16xbf16>
    %c0_2 = arith.constant 0 : index
    %c0_3 = arith.constant 0 : index
    %2 = vector.load %arg2[%c0_2, %c0_3] : memref<16x32xbf16, #tpu.memory_space<vmem>>, vector<16x32xbf16>
    %cst = arith.constant dense<0.000000e+00> : vector<176x32xf32>
    %3 = tpu.matmul %1, %2, %cst {dimension_numbers = #tpu.dot_dimension_numbers<[1], [0], [0], [1], [0, 0, 1, 1], [], []>} : vector<176x16xbf16>, vector<16x32xbf16>, vector<176x32xf32> -> vector<176x32xf32>
    %c0_4 = arith.constant 0 : index
    %c0_5 = arith.constant 0 : index
    %4 = vector.load %arg3[%c0_4, %c0_5] : memref<1x32xf32, #tpu.memory_space<vmem>>, vector<1x32xf32>
    %5 = vector.broadcast %4 : vector<1x32xf32> to vector<176x32xf32>
    %6 = arith.addf %3, %5 : vector<176x32xf32>
    %cst_6 = arith.constant 0.000000e+00 : f32
    %7 = vector.broadcast %cst_6 : f32 to vector<176x32xf32>
    %8 = arith.maximumf %6, %7 : vector<176x32xf32>
    %9 = arith.truncf %8 : vector<176x32xf32> to vector<176x32xbf16>
    %c0_7 = arith.constant 0 : index
    %c0_8 = arith.constant 0 : index
    %c0_9 = arith.constant 0 : index
    %10 = vector.load %arg4[%c0_7, %c0_8, %c0_9] : memref<9x36x176xbf16, #tpu.memory_space<vmem>>, vector<1x36x176xbf16>
    %11 = vector.shape_cast %10 : vector<1x36x176xbf16> to vector<36x176xbf16>
    %cst_10 = arith.constant dense<0.000000e+00> : vector<36x32xf32>
    %12 = tpu.matmul %11, %9, %cst_10 {dimension_numbers = #tpu.dot_dimension_numbers<[1], [0], [0], [1], [0, 0, 1, 1], [], []>} : vector<36x176xbf16>, vector<176x32xbf16>, vector<36x32xf32> -> vector<36x32xf32>
    %13 = arith.truncf %12 : vector<36x32xf32> to vector<36x32xbf16>
    %c1 = arith.constant 1 : index
    %c0_11 = arith.constant 0 : index
    %c0_12 = arith.constant 0 : index
    %14 = vector.load %arg4[%c1, %c0_11, %c0_12] : memref<9x36x176xbf16, #tpu.memory_space<vmem>>, vector<1x36x176xbf16>
    %15 = vector.shape_cast %14 : vector<1x36x176xbf16> to vector<36x176xbf16>
    %cst_13 = arith.constant dense<0.000000e+00> : vector<36x32xf32>
    %16 = tpu.matmul %15, %9, %cst_13 {dimension_numbers = #tpu.dot_dimension_numbers<[1], [0], [0], [1], [0, 0, 1, 1], [], []>} : vector<36x176xbf16>, vector<176x32xbf16>, vector<36x32xf32> -> vector<36x32xf32>
    %17 = arith.truncf %16 : vector<36x32xf32> to vector<36x32xbf16>
    %c2 = arith.constant 2 : index
    %c0_14 = arith.constant 0 : index
    %c0_15 = arith.constant 0 : index
    %18 = vector.load %arg4[%c2, %c0_14, %c0_15] : memref<9x36x176xbf16, #tpu.memory_space<vmem>>, vector<1x36x176xbf16>
    %19 = vector.shape_cast %18 : vector<1x36x176xbf16> to vector<36x176xbf16>
    %cst_16 = arith.constant dense<0.000000e+00> : vector<36x32xf32>
    %20 = tpu.matmul %19, %9, %cst_16 {dimension_numbers = #tpu.dot_dimension_numbers<[1], [0], [0], [1], [0, 0, 1, 1], [], []>} : vector<36x176xbf16>, vector<176x32xbf16>, vector<36x32xf32> -> vector<36x32xf32>
    %21 = arith.truncf %20 : vector<36x32xf32> to vector<36x32xbf16>
    %c3 = arith.constant 3 : index
    %c0_17 = arith.constant 0 : index
    %c0_18 = arith.constant 0 : index
    %22 = vector.load %arg4[%c3, %c0_17, %c0_18] : memref<9x36x176xbf16, #tpu.memory_space<vmem>>, vector<1x36x176xbf16>
    %23 = vector.shape_cast %22 : vector<1x36x176xbf16> to vector<36x176xbf16>
    %cst_19 = arith.constant dense<0.000000e+00> : vector<36x32xf32>
    %24 = tpu.matmul %23, %9, %cst_19 {dimension_numbers = #tpu.dot_dimension_numbers<[1], [0], [0], [1], [0, 0, 1, 1], [], []>} : vector<36x176xbf16>, vector<176x32xbf16>, vector<36x32xf32> -> vector<36x32xf32>
    %25 = arith.truncf %24 : vector<36x32xf32> to vector<36x32xbf16>
    %c4 = arith.constant 4 : index
    %c0_20 = arith.constant 0 : index
    %c0_21 = arith.constant 0 : index
    %26 = vector.load %arg4[%c4, %c0_20, %c0_21] : memref<9x36x176xbf16, #tpu.memory_space<vmem>>, vector<1x36x176xbf16>
    %27 = vector.shape_cast %26 : vector<1x36x176xbf16> to vector<36x176xbf16>
    %cst_22 = arith.constant dense<0.000000e+00> : vector<36x32xf32>
    %28 = tpu.matmul %27, %9, %cst_22 {dimension_numbers = #tpu.dot_dimension_numbers<[1], [0], [0], [1], [0, 0, 1, 1], [], []>} : vector<36x176xbf16>, vector<176x32xbf16>, vector<36x32xf32> -> vector<36x32xf32>
    %29 = arith.truncf %28 : vector<36x32xf32> to vector<36x32xbf16>
    %c5 = arith.constant 5 : index
    %c0_23 = arith.constant 0 : index
    %c0_24 = arith.constant 0 : index
    %30 = vector.load %arg4[%c5, %c0_23, %c0_24] : memref<9x36x176xbf16, #tpu.memory_space<vmem>>, vector<1x36x176xbf16>
    %31 = vector.shape_cast %30 : vector<1x36x176xbf16> to vector<36x176xbf16>
    %cst_25 = arith.constant dense<0.000000e+00> : vector<36x32xf32>
    %32 = tpu.matmul %31, %9, %cst_25 {dimension_numbers = #tpu.dot_dimension_numbers<[1], [0], [0], [1], [0, 0, 1, 1], [], []>} : vector<36x176xbf16>, vector<176x32xbf16>, vector<36x32xf32> -> vector<36x32xf32>
    %33 = arith.truncf %32 : vector<36x32xf32> to vector<36x32xbf16>
    %c6 = arith.constant 6 : index
    %c0_26 = arith.constant 0 : index
    %c0_27 = arith.constant 0 : index
    %34 = vector.load %arg4[%c6, %c0_26, %c0_27] : memref<9x36x176xbf16, #tpu.memory_space<vmem>>, vector<1x36x176xbf16>
    %35 = vector.shape_cast %34 : vector<1x36x176xbf16> to vector<36x176xbf16>
    %cst_28 = arith.constant dense<0.000000e+00> : vector<36x32xf32>
    %36 = tpu.matmul %35, %9, %cst_28 {dimension_numbers = #tpu.dot_dimension_numbers<[1], [0], [0], [1], [0, 0, 1, 1], [], []>} : vector<36x176xbf16>, vector<176x32xbf16>, vector<36x32xf32> -> vector<36x32xf32>
    %37 = arith.truncf %36 : vector<36x32xf32> to vector<36x32xbf16>
    %c7 = arith.constant 7 : index
    %c0_29 = arith.constant 0 : index
    %c0_30 = arith.constant 0 : index
    %38 = vector.load %arg4[%c7, %c0_29, %c0_30] : memref<9x36x176xbf16, #tpu.memory_space<vmem>>, vector<1x36x176xbf16>
    %39 = vector.shape_cast %38 : vector<1x36x176xbf16> to vector<36x176xbf16>
    %cst_31 = arith.constant dense<0.000000e+00> : vector<36x32xf32>
    %40 = tpu.matmul %39, %9, %cst_31 {dimension_numbers = #tpu.dot_dimension_numbers<[1], [0], [0], [1], [0, 0, 1, 1], [], []>} : vector<36x176xbf16>, vector<176x32xbf16>, vector<36x32xf32> -> vector<36x32xf32>
    %41 = arith.truncf %40 : vector<36x32xf32> to vector<36x32xbf16>
    %c8 = arith.constant 8 : index
    %c0_32 = arith.constant 0 : index
    %c0_33 = arith.constant 0 : index
    %42 = vector.load %arg4[%c8, %c0_32, %c0_33] : memref<9x36x176xbf16, #tpu.memory_space<vmem>>, vector<1x36x176xbf16>
    %43 = vector.shape_cast %42 : vector<1x36x176xbf16> to vector<36x176xbf16>
    %cst_34 = arith.constant dense<0.000000e+00> : vector<36x32xf32>
    %44 = tpu.matmul %43, %9, %cst_34 {dimension_numbers = #tpu.dot_dimension_numbers<[1], [0], [0], [1], [0, 0, 1, 1], [], []>} : vector<36x176xbf16>, vector<176x32xbf16>, vector<36x32xf32> -> vector<36x32xf32>
    %45 = arith.truncf %44 : vector<36x32xf32> to vector<36x32xbf16>
    %46 = tpu.concatenate %13, %17, %21, %25, %29, %33, %37, %41, %45 in 1 : vector<36x32xbf16>, vector<36x32xbf16>, vector<36x32xbf16>, vector<36x32xbf16>, vector<36x32xbf16>, vector<36x32xbf16>, vector<36x32xbf16>, vector<36x32xbf16>, vector<36x32xbf16> -> vector<36x288xbf16>
    %c0_35 = arith.constant 0 : index
    %c0_36 = arith.constant 0 : index
    %47 = vector.load %arg5[%c0_35, %c0_36] : memref<288x64xbf16, #tpu.memory_space<vmem>>, vector<288x64xbf16>
    %cst_37 = arith.constant dense<0.000000e+00> : vector<36x64xf32>
    %48 = tpu.matmul %46, %47, %cst_37 {dimension_numbers = #tpu.dot_dimension_numbers<[1], [0], [0], [1], [0, 0, 1, 1], [], []>} : vector<36x288xbf16>, vector<288x64xbf16>, vector<36x64xf32> -> vector<36x64xf32>
    %c0_38 = arith.constant 0 : index
    %c0_39 = arith.constant 0 : index
    %49 = vector.load %arg6[%c0_38, %c0_39] : memref<1x64xf32, #tpu.memory_space<vmem>>, vector<1x64xf32>
    %50 = vector.broadcast %49 : vector<1x64xf32> to vector<36x64xf32>
    %51 = arith.addf %48, %50 : vector<36x64xf32>
    %cst_40 = arith.constant 0.000000e+00 : f32
    %52 = vector.broadcast %cst_40 : f32 to vector<36x64xf32>
    %53 = arith.maximumf %51, %52 : vector<36x64xf32>
    %54 = arith.truncf %53 : vector<36x64xf32> to vector<36x64xbf16>
    %c0_41 = arith.constant 0 : index
    %c0_42 = arith.constant 0 : index
    %c0_43 = arith.constant 0 : index
    %55 = vector.load %arg7[%c0_41, %c0_42, %c0_43] : memref<9x4x36xbf16, #tpu.memory_space<vmem>>, vector<1x4x36xbf16>
    %56 = vector.shape_cast %55 : vector<1x4x36xbf16> to vector<4x36xbf16>
    %cst_44 = arith.constant dense<0.000000e+00> : vector<4x64xf32>
    %57 = tpu.matmul %56, %54, %cst_44 {dimension_numbers = #tpu.dot_dimension_numbers<[1], [0], [0], [1], [0, 0, 1, 1], [], []>} : vector<4x36xbf16>, vector<36x64xbf16>, vector<4x64xf32> -> vector<4x64xf32>
    %58 = arith.truncf %57 : vector<4x64xf32> to vector<4x64xbf16>
    %c1_45 = arith.constant 1 : index
    %c0_46 = arith.constant 0 : index
    %c0_47 = arith.constant 0 : index
    %59 = vector.load %arg7[%c1_45, %c0_46, %c0_47] : memref<9x4x36xbf16, #tpu.memory_space<vmem>>, vector<1x4x36xbf16>
    %60 = vector.shape_cast %59 : vector<1x4x36xbf16> to vector<4x36xbf16>
    %cst_48 = arith.constant dense<0.000000e+00> : vector<4x64xf32>
    %61 = tpu.matmul %60, %54, %cst_48 {dimension_numbers = #tpu.dot_dimension_numbers<[1], [0], [0], [1], [0, 0, 1, 1], [], []>} : vector<4x36xbf16>, vector<36x64xbf16>, vector<4x64xf32> -> vector<4x64xf32>
    %62 = arith.truncf %61 : vector<4x64xf32> to vector<4x64xbf16>
    %c2_49 = arith.constant 2 : index
    %c0_50 = arith.constant 0 : index
    %c0_51 = arith.constant 0 : index
    %63 = vector.load %arg7[%c2_49, %c0_50, %c0_51] : memref<9x4x36xbf16, #tpu.memory_space<vmem>>, vector<1x4x36xbf16>
    %64 = vector.shape_cast %63 : vector<1x4x36xbf16> to vector<4x36xbf16>
    %cst_52 = arith.constant dense<0.000000e+00> : vector<4x64xf32>
    %65 = tpu.matmul %64, %54, %cst_52 {dimension_numbers = #tpu.dot_dimension_numbers<[1], [0], [0], [1], [0, 0, 1, 1], [], []>} : vector<4x36xbf16>, vector<36x64xbf16>, vector<4x64xf32> -> vector<4x64xf32>
    %66 = arith.truncf %65 : vector<4x64xf32> to vector<4x64xbf16>
    %c3_53 = arith.constant 3 : index
    %c0_54 = arith.constant 0 : index
    %c0_55 = arith.constant 0 : index
    %67 = vector.load %arg7[%c3_53, %c0_54, %c0_55] : memref<9x4x36xbf16, #tpu.memory_space<vmem>>, vector<1x4x36xbf16>
    %68 = vector.shape_cast %67 : vector<1x4x36xbf16> to vector<4x36xbf16>
    %cst_56 = arith.constant dense<0.000000e+00> : vector<4x64xf32>
    %69 = tpu.matmul %68, %54, %cst_56 {dimension_numbers = #tpu.dot_dimension_numbers<[1], [0], [0], [1], [0, 0, 1, 1], [], []>} : vector<4x36xbf16>, vector<36x64xbf16>, vector<4x64xf32> -> vector<4x64xf32>
    %70 = arith.truncf %69 : vector<4x64xf32> to vector<4x64xbf16>
    %c4_57 = arith.constant 4 : index
    %c0_58 = arith.constant 0 : index
    %c0_59 = arith.constant 0 : index
    %71 = vector.load %arg7[%c4_57, %c0_58, %c0_59] : memref<9x4x36xbf16, #tpu.memory_space<vmem>>, vector<1x4x36xbf16>
    %72 = vector.shape_cast %71 : vector<1x4x36xbf16> to vector<4x36xbf16>
    %cst_60 = arith.constant dense<0.000000e+00> : vector<4x64xf32>
    %73 = tpu.matmul %72, %54, %cst_60 {dimension_numbers = #tpu.dot_dimension_numbers<[1], [0], [0], [1], [0, 0, 1, 1], [], []>} : vector<4x36xbf16>, vector<36x64xbf16>, vector<4x64xf32> -> vector<4x64xf32>
    %74 = arith.truncf %73 : vector<4x64xf32> to vector<4x64xbf16>
    %c5_61 = arith.constant 5 : index
    %c0_62 = arith.constant 0 : index
    %c0_63 = arith.constant 0 : index
    %75 = vector.load %arg7[%c5_61, %c0_62, %c0_63] : memref<9x4x36xbf16, #tpu.memory_space<vmem>>, vector<1x4x36xbf16>
    %76 = vector.shape_cast %75 : vector<1x4x36xbf16> to vector<4x36xbf16>
    %cst_64 = arith.constant dense<0.000000e+00> : vector<4x64xf32>
    %77 = tpu.matmul %76, %54, %cst_64 {dimension_numbers = #tpu.dot_dimension_numbers<[1], [0], [0], [1], [0, 0, 1, 1], [], []>} : vector<4x36xbf16>, vector<36x64xbf16>, vector<4x64xf32> -> vector<4x64xf32>
    %78 = arith.truncf %77 : vector<4x64xf32> to vector<4x64xbf16>
    %c6_65 = arith.constant 6 : index
    %c0_66 = arith.constant 0 : index
    %c0_67 = arith.constant 0 : index
    %79 = vector.load %arg7[%c6_65, %c0_66, %c0_67] : memref<9x4x36xbf16, #tpu.memory_space<vmem>>, vector<1x4x36xbf16>
    %80 = vector.shape_cast %79 : vector<1x4x36xbf16> to vector<4x36xbf16>
    %cst_68 = arith.constant dense<0.000000e+00> : vector<4x64xf32>
    %81 = tpu.matmul %80, %54, %cst_68 {dimension_numbers = #tpu.dot_dimension_numbers<[1], [0], [0], [1], [0, 0, 1, 1], [], []>} : vector<4x36xbf16>, vector<36x64xbf16>, vector<4x64xf32> -> vector<4x64xf32>
    %82 = arith.truncf %81 : vector<4x64xf32> to vector<4x64xbf16>
    %c7_69 = arith.constant 7 : index
    %c0_70 = arith.constant 0 : index
    %c0_71 = arith.constant 0 : index
    %83 = vector.load %arg7[%c7_69, %c0_70, %c0_71] : memref<9x4x36xbf16, #tpu.memory_space<vmem>>, vector<1x4x36xbf16>
    %84 = vector.shape_cast %83 : vector<1x4x36xbf16> to vector<4x36xbf16>
    %cst_72 = arith.constant dense<0.000000e+00> : vector<4x64xf32>
    %85 = tpu.matmul %84, %54, %cst_72 {dimension_numbers = #tpu.dot_dimension_numbers<[1], [0], [0], [1], [0, 0, 1, 1], [], []>} : vector<4x36xbf16>, vector<36x64xbf16>, vector<4x64xf32> -> vector<4x64xf32>
    %86 = arith.truncf %85 : vector<4x64xf32> to vector<4x64xbf16>
    %c8_73 = arith.constant 8 : index
    %c0_74 = arith.constant 0 : index
    %c0_75 = arith.constant 0 : index
    %87 = vector.load %arg7[%c8_73, %c0_74, %c0_75] : memref<9x4x36xbf16, #tpu.memory_space<vmem>>, vector<1x4x36xbf16>
    %88 = vector.shape_cast %87 : vector<1x4x36xbf16> to vector<4x36xbf16>
    %cst_76 = arith.constant dense<0.000000e+00> : vector<4x64xf32>
    %89 = tpu.matmul %88, %54, %cst_76 {dimension_numbers = #tpu.dot_dimension_numbers<[1], [0], [0], [1], [0, 0, 1, 1], [], []>} : vector<4x36xbf16>, vector<36x64xbf16>, vector<4x64xf32> -> vector<4x64xf32>
    %90 = arith.truncf %89 : vector<4x64xf32> to vector<4x64xbf16>
    %91 = tpu.concatenate %58, %62, %66, %70, %74, %78, %82, %86, %90 in 1 : vector<4x64xbf16>, vector<4x64xbf16>, vector<4x64xbf16>, vector<4x64xbf16>, vector<4x64xbf16>, vector<4x64xbf16>, vector<4x64xbf16>, vector<4x64xbf16>, vector<4x64xbf16> -> vector<4x576xbf16>
    %c0_77 = arith.constant 0 : index
    %c0_78 = arith.constant 0 : index
    %92 = vector.load %arg8[%c0_77, %c0_78] : memref<576x64xbf16, #tpu.memory_space<vmem>>, vector<576x64xbf16>
    %cst_79 = arith.constant dense<0.000000e+00> : vector<4x64xf32>
    %93 = tpu.matmul %91, %92, %cst_79 {dimension_numbers = #tpu.dot_dimension_numbers<[1], [0], [0], [1], [0, 0, 1, 1], [], []>} : vector<4x576xbf16>, vector<576x64xbf16>, vector<4x64xf32> -> vector<4x64xf32>
    %c0_80 = arith.constant 0 : index
    %c0_81 = arith.constant 0 : index
    %94 = vector.load %arg9[%c0_80, %c0_81] : memref<1x64xf32, #tpu.memory_space<vmem>>, vector<1x64xf32>
    %95 = vector.broadcast %94 : vector<1x64xf32> to vector<4x64xf32>
    %96 = arith.addf %93, %95 : vector<4x64xf32>
    %cst_82 = arith.constant 0.000000e+00 : f32
    %97 = vector.broadcast %cst_82 : f32 to vector<4x64xf32>
    %98 = arith.maximumf %96, %97 : vector<4x64xf32>
    %99 = vector.extract_strided_slice %98 {offsets = [0, 0], sizes = [1, 64], strides = [1, 1]} : vector<4x64xf32> to vector<1x64xf32>
    %100 = vector.extract_strided_slice %98 {offsets = [1, 0], sizes = [1, 64], strides = [1, 1]} : vector<4x64xf32> to vector<1x64xf32>
    %101 = vector.extract_strided_slice %98 {offsets = [2, 0], sizes = [1, 64], strides = [1, 1]} : vector<4x64xf32> to vector<1x64xf32>
    %102 = vector.extract_strided_slice %98 {offsets = [3, 0], sizes = [1, 64], strides = [1, 1]} : vector<4x64xf32> to vector<1x64xf32>
    %103 = tpu.concatenate %99, %100, %101, %102 in 1 : vector<1x64xf32>, vector<1x64xf32>, vector<1x64xf32>, vector<1x64xf32> -> vector<1x256xf32>
    %104 = arith.truncf %103 : vector<1x256xf32> to vector<1x256xbf16>
    %c0_83 = arith.constant 0 : index
    %c0_84 = arith.constant 0 : index
    %105 = vector.load %arg10[%c0_83, %c0_84] : memref<256x32xbf16, #tpu.memory_space<vmem>>, vector<256x32xbf16>
    %cst_85 = arith.constant dense<0.000000e+00> : vector<1x32xf32>
    %106 = tpu.matmul %104, %105, %cst_85 {dimension_numbers = #tpu.dot_dimension_numbers<[1], [0], [0], [1], [0, 0, 1, 1], [], []>} : vector<1x256xbf16>, vector<256x32xbf16>, vector<1x32xf32> -> vector<1x32xf32>
    %c0_86 = arith.constant 0 : index
    %c0_87 = arith.constant 0 : index
    %107 = vector.load %arg11[%c0_86, %c0_87] : memref<1x32xf32, #tpu.memory_space<vmem>>, vector<1x32xf32>
    %108 = arith.addf %106, %107 : vector<1x32xf32>
    %cst_88 = arith.constant 0.000000e+00 : f32
    %109 = vector.broadcast %cst_88 : f32 to vector<1x32xf32>
    %110 = arith.maximumf %108, %109 : vector<1x32xf32>
    %111 = arith.truncf %110 : vector<1x32xf32> to vector<1x32xbf16>
    %c0_89 = arith.constant 0 : index
    %c0_90 = arith.constant 0 : index
    %112 = vector.load %arg12[%c0_89, %c0_90] : memref<32x11xbf16, #tpu.memory_space<vmem>>, vector<32x11xbf16>
    %cst_91 = arith.constant dense<0.000000e+00> : vector<1x11xf32>
    %113 = tpu.matmul %111, %112, %cst_91 {dimension_numbers = #tpu.dot_dimension_numbers<[1], [0], [0], [1], [0, 0, 1, 1], [], []>} : vector<1x32xbf16>, vector<32x11xbf16>, vector<1x11xf32> -> vector<1x11xf32>
    %c0_92 = arith.constant 0 : index
    %c0_93 = arith.constant 0 : index
    %114 = vector.load %arg13[%c0_92, %c0_93] : memref<1x11xf32, #tpu.memory_space<vmem>>, vector<1x11xf32>
    %115 = arith.addf %113, %114 : vector<1x11xf32>
    %cst_94 = arith.constant 0.000000e+00 : f32
    %116 = vector.broadcast %cst_94 : f32 to vector<1x85xf32>
    %117 = tpu.concatenate %110, %115, %116 in 1 : vector<1x32xf32>, vector<1x11xf32>, vector<1x85xf32> -> vector<1x128xf32>
    %c0_95 = arith.constant 0 : index
    %c0_96 = arith.constant 0 : index
    %c0_97 = arith.constant 0 : index
    %118 = vector.load %arg14[%c0_95, %c0_96, %c0_97] : memref<1x1x128xf32, #tpu.memory_space<vmem>>, vector<1x1x128xf32>
    %119 = vector.shape_cast %118 : vector<1x1x128xf32> to vector<1x128xf32>
    %120 = vector.shape_cast %117 : vector<1x128xf32> to vector<1x1x128xf32>
    tpu.vector_store %arg14[%c0_95, %c0_96, %c0_97], %120 {strides = array<i32>} : memref<1x1x128xf32, #tpu.memory_space<vmem>>, vector<1x1x128xf32>,
    return
  }
  func.func @transform_0(%arg0: i32) -> (i32, i32, i32) {
    %c0_i32 = arith.constant 0 : i32
    %c0_i32_0 = arith.constant 0 : i32
    %c0_i32_1 = arith.constant 0 : i32
    return %arg0, %c0_i32, %c0_i32_0 : i32, i32, i32
  }
  func.func @transform_1(%arg0: i32) -> (i32, i32) {
    %c0_i32 = arith.constant 0 : i32
    %c0_i32_0 = arith.constant 0 : i32
    %c0_i32_1 = arith.constant 0 : i32
    return %c0_i32, %c0_i32_0 : i32, i32
  }
  func.func @transform_2(%arg0: i32) -> (i32, i32) {
    %c0_i32 = arith.constant 0 : i32
    %c0_i32_0 = arith.constant 0 : i32
    %c0_i32_1 = arith.constant 0 : i32
    return %c0_i32, %c0_i32_0 : i32, i32
  }
  func.func @transform_3(%arg0: i32) -> (i32, i32, i32) {
    %c0_i32 = arith.constant 0 : i32
    %c0_i32_0 = arith.constant 0 : i32
    %c0_i32_1 = arith.constant 0 : i32
    %c0_i32_2 = arith.constant 0 : i32
    return %c0_i32, %c0_i32_0, %c0_i32_1 : i32, i32, i32
  }
  func.func @transform_4(%arg0: i32) -> (i32, i32) {
    %c0_i32 = arith.constant 0 : i32
    %c0_i32_0 = arith.constant 0 : i32
    %c0_i32_1 = arith.constant 0 : i32
    return %c0_i32, %c0_i32_0 : i32, i32
  }
  func.func @transform_5(%arg0: i32) -> (i32, i32) {
    %c0_i32 = arith.constant 0 : i32
    %c0_i32_0 = arith.constant 0 : i32
    %c0_i32_1 = arith.constant 0 : i32
    return %c0_i32, %c0_i32_0 : i32, i32
  }
  func.func @transform_6(%arg0: i32) -> (i32, i32, i32) {
    %c0_i32 = arith.constant 0 : i32
    %c0_i32_0 = arith.constant 0 : i32
    %c0_i32_1 = arith.constant 0 : i32
    %c0_i32_2 = arith.constant 0 : i32
    return %c0_i32, %c0_i32_0, %c0_i32_1 : i32, i32, i32
  }
  func.func @transform_7(%arg0: i32) -> (i32, i32) {
    %c0_i32 = arith.constant 0 : i32
    %c0_i32_0 = arith.constant 0 : i32
    %c0_i32_1 = arith.constant 0 : i32
    return %c0_i32, %c0_i32_0 : i32, i32
  }
  func.func @transform_8(%arg0: i32) -> (i32, i32) {
    %c0_i32 = arith.constant 0 : i32
    %c0_i32_0 = arith.constant 0 : i32
    %c0_i32_1 = arith.constant 0 : i32
    return %c0_i32, %c0_i32_0 : i32, i32
  }
  func.func @transform_9(%arg0: i32) -> (i32, i32) {
    %c0_i32 = arith.constant 0 : i32
    %c0_i32_0 = arith.constant 0 : i32
    %c0_i32_1 = arith.constant 0 : i32
    return %c0_i32, %c0_i32_0 : i32, i32
  }
  func.func @transform_10(%arg0: i32) -> (i32, i32) {
    %c0_i32 = arith.constant 0 : i32
    %c0_i32_0 = arith.constant 0 : i32
    %c0_i32_1 = arith.constant 0 : i32
    return %c0_i32, %c0_i32_0 : i32, i32
  }
  func.func @transform_11(%arg0: i32) -> (i32, i32) {
    %c0_i32 = arith.constant 0 : i32
    %c0_i32_0 = arith.constant 0 : i32
    %c0_i32_1 = arith.constant 0 : i32
    return %c0_i32, %c0_i32_0 : i32, i32
  }
  func.func @transform_12(%arg0: i32) -> (i32, i32) {
    %c0_i32 = arith.constant 0 : i32
    %c0_i32_0 = arith.constant 0 : i32
    %c0_i32_1 = arith.constant 0 : i32
    return %c0_i32, %c0_i32_0 : i32, i32
  }
  func.func @transform_13(%arg0: i32) -> (i32, i32, i32) {
    %c0_i32 = arith.constant 0 : i32
    %c0_i32_0 = arith.constant 0 : i32
    %c0_i32_1 = arith.constant 0 : i32
    return %arg0, %c0_i32, %c0_i32_0 : i32, i32, i32
  }
}

</mosaic_0001>

<bundles_post_ra>
// kernel: forward.1
= control target key start
LH: loop header
LB: loop body
LE: loop exit
PB: predicated region body
PF: predicated region fallthrough
CT: control target
= control target key end

     0   :  { %s3545_s25 = smov 0   ;;  %s4470_s0 = inlined_call_operand.vmem [shape: bf16[2,176,16], index: 0, kind: input, shape index: {}]   ;;  %s4471_s1 = inlined_call_operand.vmem [shape: bf16[16,32], index: 1, kind: input, shape index: {}]   ;;  %s4472_s2 = inlined_call_operand.vmem [shape: f32[1,32], index: 2, kind: input, shape index: {}]   ;;  %s4473_s3 = inlined_call_operand.vmem [shape: bf16[9,36,176], index: 3, kind: input, shape index: {}]   ;;  %s4474_s4 = inlined_call_operand.vmem [shape: bf16[288,64], index: 4, kind: input, shape index: {}]   ;;  %s4475_s5 = inlined_call_operand.vmem [shape: f32[1,64], index: 5, kind: input, shape index: {}]   ;;  %s4476_s6 = inlined_call_operand.vmem [shape: bf16[9,4,36], index: 6, kind: input, shape index: {}]   ;;  %s4477_s7 = inlined_call_operand.vmem [shape: bf16[576,64], index: 7, kind: input, shape index: {}]   ;;  %s4478_s8 = inlined_call_operand.vmem [shape: f32[1,64], index: 8, kind: input, shape index: {}]   ;;  %s4479_s9 = inlined_call_operand.vmem [shape: bf16[256,32], index: 9, kind: input, shape index: {}]   ;;  %s4480_s10 = inlined_call_operand.vmem [shape: f32[1,32], index: 10, kind: input, shape index: {}]   ;;  %s4481_s11 = inlined_call_operand.vmem [shape: bf16[32,11], index: 11, kind: input, shape index: {}]   ;;  %s4482_s12 = inlined_call_operand.vmem [shape: f32[1,11], index: 12, kind: input, shape index: {}]   ;;  %s4483_s13 = inlined_call_operand.vmem [shape: f32[2,1,128], index: 13, kind: output, shape index: {}]  }
   0x1 LB: > { %s2738_s26 = sadd.s32 4294967295, %s3470_s25   ;;  %p2742_p0 = scmp.ge.s32.totalorder %s3470_s25, 1  ;;  %s3470_s25 = sphi %s3545_s25, %s23_s25  }
   0x2   : > { %p387_p1 = scmp.lt.s32.totalorder %s3470_s25, 3 }
   0x4   : > { %p388_p2 = pnand %p2742_p0, %p387_p1 }
   0x5   : > { %p429_p3 = scmp.lt.s32.totalorder (!%p388_p2), %s2738_s26, 1  ;;  %s3472_s18 = smov (!%p388_p2), 64  }
   0x6   : > { %391 = sbr.rel (%p388_p2) target bundleno = 1918 (0x77e), region = 72  ;;  %s3473_s14 = smov (!%p388_p2), 96  }
   0xb   : > { %v3337_v0 = vld [vmem:[%s4471_s1] sm:$0xff]  ;;  %s4485_s26 = smov (!%p429_p3, %s2738_s26), 1  ;;  %vm527_vm0 = vcmask 130048   ;;  %vm687_vm1 = vcmask 392192   ;;  %vm1631_vm2 = vcmask 523264   ;;  %vm1621_vm3 = vcmask 261120  }
   0xc   : > { %568 = vmatpush.bf16.msra.mxu0 %v3337_v0  ;;  %s3449_s29 = smul.u32 88, %s4485_s26  ;;  %v3580_v27 = vld [vmem:[%s4472_s2] ss:$0 sm:$0xff]  ;;  %vm1638_vm4 = vcmask 785408   ;;  %vm1911_vm5 = vcmask 1041408   ;;  %vm1907_vm6 = vcmask 293888   ;;  %s436_s23 = scalar_lea.vmem %s4483_s13, %s4485_s26 }
   0xd   : > { %vm2688_vm7 = vcmask 351232  }
   0xe   : > { %s433_s15 = scalar_lea.vmem %s4470_s0, %s3449_s29 }
   0xf   : > { %v3326_v1 = vld [vmem:[%s433_s15] sm:$0xff]  ;;  %v3327_v2 = vld [vmem:[%s433_s15 + $0x8] sm:$0xff]  ;;  %v3328_v3 = vld [vmem:[%s433_s15 + $0x10] sm:$0xff] }
  0x10   : > { %2792 = vmatmul.msk.bf16.vlgmr.msra.gmra.mxu0 %vm527_vm0, %v3326_v1  ;;  %v3329_v4 = vld [vmem:[%s433_s15 + $0x18] sm:$0xff]  ;;  %v3330_v5 = vld [vmem:[%s433_s15 + $0x20] sm:$0xff]  ;;  %v3331_v6 = vld [vmem:[%s433_s15 + $0x28] sm:$0xff] }
  0x11   : > { %v3332_v7 = vld [vmem:[%s433_s15 + $0x30] sm:$0xff]  ;;  %v3333_v8 = vld [vmem:[%s433_s15 + $0x38] sm:$0xff]  ;;  %v3334_v9 = vld [vmem:[%s433_s15 + $0x40] sm:$0xff] }
  0x12   : > { %v3335_v12 = vld [vmem:[%s433_s15 + $0x48] sm:$0xff]  ;;  %v3336_v15 = vld [vmem:[%s433_s15 + $0x50] sm:$0xff]  ;;  %s3474_s15 = smov 32  }
  0x20   : > { %2793 = vmatmul.msk.bf16.gmra.mxu0 %vm527_vm0, %v3327_v2 }
  0x30   : > { %2794 = vmatmul.msk.bf16.gmra.mxu0 %vm527_vm0, %v3328_v3 }
  0x40   : > { %2795 = vmatmul.msk.bf16.gmra.mxu0 %vm527_vm0, %v3329_v4 }
  0x50   : > { %2796 = vmatmul.msk.bf16.gmra.mxu0 %vm527_vm0, %v3330_v5 }
  0x60   : > { %2797 = vmatmul.msk.bf16.gmra.mxu0 %vm527_vm0, %v3331_v6 }
  0x70   : > { %2798 = vmatmul.msk.bf16.gmra.mxu0 %vm527_vm0, %v3332_v7  ;;  %v2805_v7 = vld [vmem:[%s4473_s3] sm:$0xf] }
  0x80   : > { %2799 = vmatmul.msk.bf16.gmra.mxu0 %vm527_vm0, %v3333_v8  ;;  %v3339_v8 = vld [vmem:[%s4473_s3 + $0x4] sm:$0xf0] }
  0x8d   : > { %v3570_v10 = vpop.f32.mrf.mxu0 }
  0x8e   : > { %v571_v2 = vadd.f32 %v3580_v27, %v3570_v10  ;;  %v3343_v10 = vld [vmem:[%s4473_s3 + $0x2c] sm:$0xf0] }
  0x90   : > { %2800 = vmatmul.msk.bf16.gmra.mxu0 %vm527_vm0, %v3334_v9  ;;  %v625_v6 = vmax.f32 %v571_v2, 0.0  ;;  %v2829_v9 = vld [vmem:[%s4473_s3 + $0x28] sm:$0xf]  ;;  %v3348_v2 = vld [vmem:[%s4473_s3 + $0x64] sm:$0xf] }
  0x95   : > { %v3573_v11 = vpop.f32.mrf.mxu0 }
  0x96   : > { %v573_v63 = vadd.f32 %v3580_v27, %v3573_v11 }
  0x98   : > { %v626_v4 = vmax.f32 %v573_v63, 0.0  ;;  %v2861_v63 = vld [vmem:[%s4473_s3 + $0x60] sm:$0xf] }
  0x9d   : > { %v575_v13 = vpop.f32.mrf.mxu0 }
  0x9e   : > { %v576_v60 = vadd.f32 %v3580_v27, %v575_v13  ;;  %v2806_v13 = vor.u32 %v3339_v8, %v2805_v7  ;;  %v3342_v7 = vld [vmem:[%s4473_s3 + $0x2c] sm:$0xf]  ;;  %v2831_v8 = vld [vmem:[%s4473_s3 + $0x30] sm:$0xf0] }
  0xa0   : > { %2801 = vmatmul.msk.bf16.gmra.mxu0 %vm527_vm0, %v3335_v12  ;;  %v627_v3 = vmax.f32 %v576_v60, 0.0  ;;  %v3651_v12 = vpack.c.bf16 %v626_v4, %v625_v6 }
  0xa5   : > { %v577_v14 = vpop.f32.mrf.mxu0 }
  0xa6   : > { %v578_v57 = vadd.f32 %v3580_v27, %v577_v14  ;;  %v2830_v14 = vor.u32 %v3343_v10, %v2829_v9  ;;  %v2850_v9 = vld [vmem:[%s4473_s3 + $0x70] sm:$0x33]  ;;  %v2834_v10 = vor.u32 %v3342_v7, %v2831_v8 }
  0xa8   : > { %v628_v0 = vmax.f32 %v578_v57, 0.0  ;;  %v3347_v57 = vld [vmem:[%s4473_s3 + $0x54] sm:$0xf0] }
  0xaa   : > { %v3634_v5 = vpack.c.bf16 %v628_v0, %v627_v3  ;;  %v3349_v0 = vld [vmem:[%s4473_s3 + $0x64] sm:$0xf0]  ;;  %v2863_v3 = vld [vmem:[%s4473_s3 + $0x68] sm:$0xf0] }
  0xab   : > { %v2862_v4 = vor.u32 %v3349_v0, %v2861_v63  ;;  %v2866_v6 = vor.u32 %v3348_v2, %v2863_v3  ;;  %v2935_v63 = vld [vmem:[%s4473_s3 + $0xe0] sm:$0xf0] }
  0xad   : > { %v580_v16 = vpop.f32.mrf.mxu0 }
  0xae   : > { %v581_v55 = vadd.f32 %v3580_v27, %v580_v16  ;;  %v2813_v16 = vld [vmem:[%s4473_s3 + $0x10] sm:$0xf] }
  0xb0   : > { %2802 = vmatmul.msk.bf16.gmra.mxu0 %vm527_vm0, %v3336_v15  ;;  %v629_v61 = vmax.f32 %v581_v55, 0.0  ;;  %v2855_v55 = vld [vmem:[%s4473_s3 + $0x58] sm:$0xf0] }
  0xb5   : > { %v582_v17 = vpop.f32.mrf.mxu0 }
  0xb6   : > { %v583_v52 = vadd.f32 %v3580_v27, %v582_v17 }
  0xb8   : > { %v630_v58 = vmax.f32 %v583_v52, 0.0 }
  0xba   : > { %v3627_v1 = vpack.c.bf16 %v630_v58, %v629_v61 }
  0xbd   : > { %v585_v18 = vpop.f32.mrf.mxu0 }
  0xbe   : > { %v586_v49 = vadd.f32 %v3580_v27, %v585_v18  ;;  %v3341_v18 = vld [vmem:[%s4473_s3 + $0x14] sm:$0xf0] }
  0xc0   : > { %v631_v56 = vmax.f32 %v586_v49, 0.0 }
  0xc5   : > { %v587_v19 = vpop.f32.mrf.mxu0 }
  0xc6   : > { %v588_v46 = vadd.f32 %v3580_v27, %v587_v19  ;;  %v2837_v19 = vld [vmem:[%s4473_s3 + $0x38] sm:$0xf] }
  0xc8   : > { %v632_v53 = vmax.f32 %v588_v46, 0.0 }
  0xca   : > { %v3619_v59 = vpack.c.bf16 %v632_v53, %v631_v56  ;;  %v3346_v53 = vld [vmem:[%s4473_s3 + $0x54] sm:$0xf]  ;;  %v2853_v56 = vld [vmem:[%s4473_s3 + $0x50] sm:$0xf] }
  0xcb   : > { %v2858_v58 = vor.u32 %v3346_v53, %v2855_v55  ;;  %v2854_v60 = vor.u32 %v3347_v57, %v2853_v56  ;;  %v2874_v55 = vld [vmem:[%s4473_s3 + $0x98] sm:$0x33] }
  0xcc   : > { %v947_v57 = vunpack.c.l.b16 %v2874_v55 }
  0xcd   : > { %v590_v20 = vpop.f32.mrf.mxu0 }
  0xce   : > { %v591_v44 = vadd.f32 %v3580_v27, %v590_v20  ;;  %v3345_v20 = vld [vmem:[%s4473_s3 + $0x3c] sm:$0xf0] }
  0xd0   : > { %v633_v50 = vmax.f32 %v591_v44, 0.0 }
  0xd5   : > { %v592_v21 = vpop.f32.mrf.mxu0 }
  0xd6   : > { %v593_v41 = vadd.f32 %v3580_v27, %v592_v21 }
  0xd8   : > { %v634_v47 = vmax.f32 %v593_v41, 0.0  ;;  %v662_v41 = vld [vmem:[%s4473_s3 + $0x20] sm:$0x33] }
  0xd9   : > { %v676_v46 = vunpack.c.l.b16 %v662_v41  ;;  %v677_v61 = vunpack.c.h.b16 %v662_v41  ;;  %v3353_v41 = vld [vmem:[%s4473_s3 + $0x8c] sm:$0xf0] }
  0xda   : > { %v3612_v54 = vpack.c.bf16 %v634_v47, %v633_v50  ;;  %v3340_v50 = vld [vmem:[%s4473_s3 + $0x14] sm:$0xf] }
  0xdb   : > { %v682_v49 = vpack.c.b16 %v676_v46, %v676_v46  ;;  %v2927_v46 = vld [vmem:[%s4473_s3 + $0xd0] sm:$0xf0] }
  0xdd   : > { %v595_v22 = vpop.f32.mrf.mxu0 }
  0xde   : > { %v596_v38 = vadd.f32 %v3580_v27, %v595_v22 }
  0xe0   : > { %v635_v45 = vmax.f32 %v596_v38, 0.0 }
  0xe5   : > { %v597_v23 = vpop.f32.mrf.mxu0 }
  0xe6   : > { %v598_v35 = vadd.f32 %v3580_v27, %v597_v23 }
  0xe8   : > { %v636_v42 = vmax.f32 %v598_v35, 0.0 }
  0xea   : > { %v3603_v48 = vpack.c.bf16 %v636_v42, %v635_v45 }
  0xed   : > { %v600_v24 = vpop.f32.mrf.mxu0 }
  0xee   : > { %v601_v32 = vadd.f32 %v3580_v27, %v600_v24  ;;  %v2814_v24 = vor.u32 %v3341_v18, %v2813_v16  ;;  %v3344_v16 = vld [vmem:[%s4473_s3 + $0x3c] sm:$0xf] }
  0xf0   : > { %v637_v39 = vmax.f32 %v601_v32, 0.0 }
  0xf5   : > { %v602_v25 = vpop.f32.mrf.mxu0 }
  0xf6   : > { %v603_v30 = vadd.f32 %v3580_v27, %v602_v25  ;;  %v2838_v25 = vor.u32 %v3345_v20, %v2837_v19  ;;  %v3350_v19 = vld [vmem:[%s4473_s3 + $0x7c] sm:$0xf]  ;;  %v2879_v20 = vld [vmem:[%s4473_s3 + $0x80] sm:$0xf0] }
  0xf8   : > { %v638_v36 = vmax.f32 %v603_v30, 0.0 }
  0xfa   : > { %v3596_v43 = vpack.c.bf16 %v638_v36, %v637_v39  ;;  %v2807_v39 = vld [vmem:[%s4473_s3 + $0x8] sm:$0xf0] }
  0xfd   : > { %v605_v26 = vpop.f32.mrf.mxu0 }
  0xfe   : > { %v606_v28 = vadd.f32 %v3580_v27, %v605_v26 }
 0x100   : > { %v639_v33 = vmax.f32 %v606_v28, 0.0 }
 0x105   : > { %v607_v29 = vpop.f32.mrf.mxu0 }
 0x106   : > { %v608_v31 = vadd.f32 %v3580_v27, %v607_v29 }
 0x108   : > { %v640_v34 = vmax.f32 %v608_v31, 0.0 }
 0x10a   : > { %v3587_v37 = vpack.c.bf16 %v640_v34, %v639_v33 }
 0x10c   : > { %697 = vmatpush.bf16.msra.mxu1 %v3587_v37  ;;  %787 = vmatpush.bf16.msra.mxu3 %v3587_v37 }
 0x10d   : > { %1237 = vmatpush.bf16.msrb.mxu0 %v3587_v37  ;;  %v3593_v40 = vpop.f32.mrf.mxu0 }
 0x10e   : > { %v611_v33 = vadd.f32 %v3580_v27, %v3593_v40  ;;  %v3705_v40 = vld [vmem:[%s4473_s3 + $0x48] sm:$0x33] }
 0x10f   : > { %v767_v45 = vunpack.c.l.b16 %v3705_v40 }
 0x110   : > { %698 = vmatpush.bf16.msra.mxu1 %v3596_v43  ;;  %788 = vmatpush.bf16.msra.mxu3 %v3596_v43  ;;  %v641_v38 = vmax.f32 %v611_v33, 0.0  ;;  %v3351_v33 = vld [vmem:[%s4473_s3 + $0x7c] sm:$0xf0] }
 0x111   : > { %1238 = vmatpush.bf16.msrb.mxu0 %v3596_v43  ;;  %v773_v47 = vpack.c.b16 %v767_v45, %v767_v45 }
 0x114   : > { %699 = vmatpush.bf16.msra.mxu1 %v3603_v48  ;;  %789 = vmatpush.bf16.msra.mxu3 %v3603_v48 }
 0x115   : > { %1239 = vmatpush.bf16.msrb.mxu0 %v3603_v48  ;;  %v3609_v51 = vpop.f32.mrf.mxu0 }
 0x116   : > { %v613_v30 = vadd.f32 %v3580_v27, %v3609_v51  ;;  %v2815_v51 = vld [vmem:[%s4473_s3 + $0x18] sm:$0xf0] }
 0x117   : > { %v2818_v52 = vor.u32 %v3340_v50, %v2815_v51  ;;  %v3361_v50 = vld [vmem:[%s4473_s3 + $0xdc] sm:$0xf0] }
 0x118   : > { %700 = vmatpush.bf16.msra.mxu1 %v3612_v54  ;;  %790 = vmatpush.bf16.msra.mxu3 %v3612_v54  ;;  %v642_v35 = vmax.f32 %v613_v30, 0.0 }
 0x119   : > { %1240 = vmatpush.bf16.msrb.mxu0 %v3612_v54 }
 0x11a   : > { %v3711_v42 = vpack.c.bf16 %v642_v35, %v641_v38  ;;  %v3359_v38 = vld [vmem:[%s4473_s3 + $0xcc] sm:$0xf0] }
 0x11c   : > { %701 = vmatpush.bf16.msra.mxu1 %v3619_v59  ;;  %791 = vmatpush.bf16.msra.mxu3 %v3619_v59 }
 0x11d   : > { %1241 = vmatpush.bf16.msrb.mxu0 %v3619_v59  ;;  %v615_v62 = vpop.f32.mrf.mxu0 }
 0x11e   : > { %v616_v26 = vadd.f32 %v3580_v27, %v615_v62  ;;  %v683_v62 = vpack.c.b16 %v677_v61, %v677_v61  ;;  %v2922_v61 = vld [vmem:[%s4473_s3 + $0xe8] sm:$0x33] }
 0x11f   : > { %v1127_v0 = vunpack.c.l.b16 %v2922_v61 }
 0x120   : > { %702 = vmatpush.bf16.msra.mxu1 %v3627_v1  ;;  %792 = vmatpush.bf16.msra.mxu3 %v3627_v1  ;;  %v643_v34 = vmax.f32 %v616_v26, 0.0 }
 0x121   : > { %1242 = vmatpush.bf16.msrb.mxu0 %v3627_v1 }
 0x124   : > { %703 = vmatpush.bf16.msra.mxu1 %v3634_v5  ;;  %793 = vmatpush.bf16.msra.mxu3 %v3634_v5 }
 0x125   : > { %1243 = vmatpush.bf16.msrb.mxu0 %v3634_v5  ;;  %v617_v11 = vpop.f32.mrf.mxu0 }
 0x126   : > { %v618_v22 = vadd.f32 %v3580_v27, %v617_v11  ;;  %v857_v11 = vunpack.c.l.b16 %v2850_v9 }
 0x128   : > { %704 = vmatpush.bf16.msra.mxu1 %v3651_v12  ;;  %794 = vmatpush.bf16.msra.mxu3 %v3651_v12  ;;  %v644_v31 = vmax.f32 %v618_v22, 0.0  ;;  %v3355_v22 = vld [vmem:[%s4473_s3 + $0xa4] sm:$0xf0] }
 0x129   : > { %1244 = vmatpush.bf16.msrb.mxu0 %v3651_v12 }
 0x12a   : > { %v3691_v36 = vpack.c.bf16 %v644_v31, %v643_v34  ;;  %v3854_v34 = vld [vmem:[%s4473_s3 + $0xc0] sm:$0x33] }
 0x12b   : > { %705 = vmatmul.bf16.vlgmr.msra.gmra.mxu1 %v2806_v13  ;;  %795 = vmatmul.bf16.vlgmr.msra.gmra.mxu3 %v2830_v14  ;;  %v858_v13 = vunpack.c.h.b16 %v2850_v9  ;;  %v863_v14 = vpack.c.b16 %v857_v11, %v857_v11  ;;  %v1037_v35 = vunpack.c.l.b16 %v3854_v34 }
 0x12c   : > { %877 = vmatpush.bf16.msrb.mxu1 %v3587_v37 }
 0x12d   : > { %1417 = vmatpush.bf16.msra.mxu0 %v3587_v37  ;;  %v620_v15 = vpop.f32.mrf.mxu0 }
 0x12e   : > { %v621_v17 = vadd.f32 %v3580_v27, %v620_v15  ;;  %v864_v15 = vpack.c.b16 %v858_v13, %v858_v13 }
 0x130   : > { %878 = vmatpush.bf16.msrb.mxu1 %v3596_v43  ;;  %v645_v28 = vmax.f32 %v621_v17, 0.0  ;;  %v2839_v17 = vld [vmem:[%s4473_s3 + $0x40] sm:$0xf0] }
 0x131   : > { %1418 = vmatpush.bf16.msra.mxu0 %v3596_v43  ;;  %v2842_v18 = vor.u32 %v3344_v16, %v2839_v17  ;;  %v1128_v17 = vunpack.c.h.b16 %v2922_v61 }
 0x134   : > { %879 = vmatpush.bf16.msrb.mxu1 %v3603_v48 }
 0x135   : > { %1419 = vmatpush.bf16.msra.mxu0 %v3603_v48  ;;  %v622_v21 = vpop.f32.mrf.mxu0 }
 0x136   : > { %v623_v23 = vadd.f32 %v3580_v27, %v622_v21  ;;  %v3338_v27 = vld [vmem:[%s4473_s3 + $0x4] sm:$0xf]  ;;  %v2901_v21 = vld [vmem:[%s4473_s3 + $0xa0] sm:$0xf] }
 0x137   : > { %v2810_v44 = vor.u32 %v3338_v27, %v2807_v39 }
 0x138   : > { %880 = vmatpush.bf16.msrb.mxu1 %v3612_v54  ;;  %v646_v29 = vmax.f32 %v623_v23, 0.0  ;;  %v2882_v23 = vor.u32 %v3350_v19, %v2879_v20  ;;  %v2973_v20 = vld [vmem:[%s4473_s3 + $0x118] sm:$0xf] }
 0x139   : > { %1420 = vmatpush.bf16.msra.mxu0 %v3612_v54 }
 0x13a   : > { %v3683_v32 = vpack.c.bf16 %v646_v29, %v645_v28  ;;  %v2909_v28 = vld [vmem:[%s4473_s3 + $0xb0] sm:$0xf]  ;;  %v3352_v29 = vld [vmem:[%s4473_s3 + $0x8c] sm:$0xf] }
 0x13b   : > { %710 = vmatmul.bf16.gmra.mxu1 %v2814_v24  ;;  %800 = vmatmul.bf16.gmra.mxu3 %v2838_v25  ;;  %v2902_v24 = vor.u32 %v3355_v22, %v2901_v21  ;;  %v768_v25 = vunpack.c.h.b16 %v3705_v40  ;;  %v2885_v40 = vld [vmem:[%s4473_s3 + $0x88] sm:$0xf]  ;;  %v3367_v21 = vld [vmem:[%s4473_s3 + $0x11c] sm:$0xf0] }
 0x13c   : > { %881 = vmatpush.bf16.msrb.mxu1 %v3619_v59  ;;  %725 = vmatpush.bf16.msra.mxu2 %v3683_v32  ;;  %v2886_v45 = vor.u32 %v3353_v41, %v2885_v40  ;;  %v2981_v41 = vld [vmem:[%s4473_s3 + $0x128] sm:$0xf] }
 0x13d   : > { %1421 = vmatpush.bf16.msra.mxu0 %v3619_v59  ;;  %905 = vmatpush.bf16.msrb.mxu3 %v3683_v32  ;;  %v774_v26 = vpack.c.b16 %v768_v25, %v768_v25 }
 0x140   : > { %882 = vmatpush.bf16.msrb.mxu1 %v3627_v1  ;;  %726 = vmatpush.bf16.msra.mxu2 %v3691_v36 }
 0x141   : > { %1422 = vmatpush.bf16.msra.mxu0 %v3627_v1  ;;  %906 = vmatpush.bf16.msrb.mxu3 %v3691_v36 }
 0x144   : > { %883 = vmatpush.bf16.msrb.mxu1 %v3634_v5  ;;  %727 = vmatpush.bf16.msra.mxu2 %v3711_v42 }
 0x145   : > { %1423 = vmatpush.bf16.msra.mxu0 %v3634_v5  ;;  %907 = vmatpush.bf16.msrb.mxu3 %v3711_v42 }
 0x147   : > { %2819 = vmatmul.msk.bf16.vlgmr.msra.gmra.mxu2 %vm687_vm1, %v2810_v44 }
 0x148   : > { %815 = vmatpush.bf16.msrb.mxu2 %v3683_v32  ;;  %884 = vmatpush.bf16.msrb.mxu1 %v3651_v12 }
 0x149   : > { %1057 = vmatpush.bf16.msra.mxu3 %v3587_v37  ;;  %1424 = vmatpush.bf16.msra.mxu0 %v3651_v12 }
 0x14b   : > { %805 = vmatmul.bf16.gmra.mxu3 %v773_v47  ;;  %715 = vmatmul.bf16.gmra.mxu1 %v682_v49  ;;  %v2933_v49 = vld [vmem:[%s4473_s3 + $0xd8] sm:$0xf] }
 0x14c   : > { %995 = vmatpush.bf16.msra.mxu1 %v3683_v32  ;;  %816 = vmatpush.bf16.msrb.mxu2 %v3691_v36  ;;  %v2934_v53 = vor.u32 %v3361_v50, %v2933_v49 }
 0x14d   : > { %1058 = vmatpush.bf16.msra.mxu3 %v3596_v43 }
 0x150   : > { %996 = vmatpush.bf16.msra.mxu1 %v3691_v36  ;;  %817 = vmatpush.bf16.msrb.mxu2 %v3711_v42 }
 0x151   : > { %1059 = vmatpush.bf16.msra.mxu3 %v3603_v48 }
 0x154   : > { %967 = vmatpush.bf16.msra.mxu2 %v3587_v37  ;;  %997 = vmatpush.bf16.msra.mxu1 %v3711_v42 }
 0x155   : > { %1060 = vmatpush.bf16.msra.mxu3 %v3612_v54 }
 0x157   : > { %2820 = vmatmul.msk.bf16.gmra.mxu2 %vm687_vm1, %v2818_v52 }
 0x158   : > { %968 = vmatpush.bf16.msra.mxu2 %v3596_v43 }
 0x159   : > { %1061 = vmatpush.bf16.msra.mxu3 %v3619_v59 }
 0x15b   : > { %2867 = vmatmul.msk.bf16.vlgmr.msrb.gmra.mxu3 %vm687_vm1, %v2858_v58  ;;  %885 = vmatmul.bf16.vlgmr.msrb.gmra.mxu1 %v2854_v60  ;;  %v953_v60 = vpack.c.b16 %v947_v57, %v947_v57 }
 0x15c   : > { %969 = vmatpush.bf16.msra.mxu2 %v3603_v48  ;;  %1147 = vmatpush.bf16.msrb.mxu1 %v3587_v37 }
 0x15d   : > { %1062 = vmatpush.bf16.msra.mxu3 %v3627_v1 }
 0x160   : > { %970 = vmatpush.bf16.msra.mxu2 %v3612_v54  ;;  %1148 = vmatpush.bf16.msrb.mxu1 %v3596_v43 }
 0x161   : > { %1063 = vmatpush.bf16.msra.mxu3 %v3634_v5 }
 0x164   : > { %971 = vmatpush.bf16.msra.mxu2 %v3619_v59  ;;  %1149 = vmatpush.bf16.msrb.mxu1 %v3603_v48 }
 0x165   : > { %1064 = vmatpush.bf16.msra.mxu3 %v3651_v12 }
 0x167   : > { %2821 = vmatmul.msk.bf16.gmra.mxu2 %vm687_vm1, %v683_v62  ;;  %v3360_v62 = vld [vmem:[%s4473_s3 + $0xdc] sm:$0xf] }
 0x168   : > { %972 = vmatpush.bf16.msra.mxu2 %v3627_v1  ;;  %1150 = vmatpush.bf16.msrb.mxu1 %v3612_v54  ;;  %v2938_v3 = vor.u32 %v3360_v62, %v2935_v63  ;;  %v2911_v63 = vld [vmem:[%s4473_s3 + $0xb8] sm:$0xf0] }
 0x169   : > { %1175 = vmatpush.bf16.msrb.mxu3 %v3683_v32 }
 0x16b   : > { %890 = vmatmul.bf16.gmra.mxu1 %v2862_v4  ;;  %2868 = vmatmul.msk.bf16.gmra.mxu3 %vm687_vm1, %v2866_v6  ;;  %v1133_v6 = vpack.c.b16 %v1127_v0, %v1127_v0 }
 0x16c   : > { %973 = vmatpush.bf16.msra.mxu2 %v3634_v5  ;;  %1151 = vmatpush.bf16.msrb.mxu1 %v3619_v59 }
 0x16d   : > { %1176 = vmatpush.bf16.msrb.mxu3 %v3691_v36 }
 0x170   : > { %974 = vmatpush.bf16.msra.mxu2 %v3651_v12  ;;  %1152 = vmatpush.bf16.msrb.mxu1 %v3627_v1 }
 0x171   : > { %1177 = vmatpush.bf16.msrb.mxu3 %v3711_v42 }
 0x174   : > { %1153 = vmatpush.bf16.msrb.mxu1 %v3634_v5 }
 0x177   : > { %2843 = vmatmul.msk.bf16.vlgmr.msrb.gmra.mxu2 %vm687_vm1, %v2834_v10  ;;  %v948_v10 = vunpack.c.h.b16 %v2874_v55 }
 0x178   : > { %3446 = vmatpush.bf16.msrb.mxu2 %v3683_v32  ;;  %1154 = vmatpush.bf16.msrb.mxu1 %v3651_v12 }
 0x17b   : > { %895 = vmatmul.bf16.gmra.mxu1 %v863_v14  ;;  %2869 = vmatmul.msk.bf16.gmra.mxu3 %vm687_vm1, %v864_v15  ;;  %v954_v14 = vpack.c.b16 %v948_v10, %v948_v10  ;;  %v2983_v10 = vld [vmem:[%s4473_s3 + $0x130] sm:$0xf0] }
 0x17c   : > { %3447 = vmatpush.bf16.msrb.mxu2 %v3691_v36 }
 0x180   : > { %3448 = vmatpush.bf16.msrb.mxu2 %v3711_v42 }
 0x187   : > { %2844 = vmatmul.msk.bf16.gmra.mxu2 %vm687_vm1, %v2842_v18 }
 0x18b   : > { %2891 = vmatmul.msk.bf16.vlgmr.msra.gmra.mxu1 %vm687_vm1, %v2882_v23  ;;  %1065 = vmatmul.bf16.vlgmr.msra.gmra.mxu3 %v2902_v24  ;;  %v1134_v24 = vpack.c.b16 %v1128_v17, %v1128_v17 }
 0x18c   : > { %1327 = vmatpush.bf16.msra.mxu1 %v3587_v37  ;;  %1355 = vmatpush.bf16.msra.mxu3 %v3683_v32  ;;  %v3357_v37 = vld [vmem:[%s4473_s3 + $0xb4] sm:$0xf0] }
 0x18d   : > { %v2910_v30 = vor.u32 %v3357_v37, %v2909_v28  ;;  %v2974_v28 = vor.u32 %v3367_v21, %v2973_v20  ;;  %v1038_v20 = vunpack.c.h.b16 %v3854_v34 }
 0x190   : > { %1328 = vmatpush.bf16.msra.mxu1 %v3596_v43  ;;  %1356 = vmatpush.bf16.msra.mxu3 %v3691_v36  ;;  %v2887_v43 = vld [vmem:[%s4473_s3 + $0x90] sm:$0xf0] }
 0x191   : > { %v2890_v31 = vor.u32 %v3352_v29, %v2887_v43 }
 0x194   : > { %1329 = vmatpush.bf16.msra.mxu1 %v3603_v48  ;;  %1357 = vmatpush.bf16.msra.mxu3 %v3711_v42  ;;  %v2877_v48 = vld [vmem:[%s4473_s3 + $0x78] sm:$0xf] }
 0x197   : > { %2845 = vmatmul.msk.bf16.gmra.mxu2 %vm687_vm1, %v774_v26 }
 0x198   : > { %1330 = vmatpush.bf16.msra.mxu1 %v3612_v54  ;;  %v2878_v54 = vor.u32 %v3351_v33, %v2877_v48 }
 0x19b   : > { %1070 = vmatmul.bf16.gmra.mxu3 %v2910_v30  ;;  %2892 = vmatmul.msk.bf16.gmra.mxu1 %vm687_vm1, %v2890_v31  ;;  %v3354_v30 = vld [vmem:[%s4473_s3 + $0xa4] sm:$0xf]  ;;  %v2903_v31 = vld [vmem:[%s4473_s3 + $0xa8] sm:$0xf0] }
 0x19c   : > { %1331 = vmatpush.bf16.msra.mxu1 %v3619_v59  ;;  %v2925_v59 = vld [vmem:[%s4473_s3 + $0xc8] sm:$0xf] }
 0x19d   : > { %v2926_v39 = vor.u32 %v3359_v38, %v2925_v59  ;;  %v2906_v59 = vor.u32 %v3354_v30, %v2903_v31  ;;  %v1044_v30 = vpack.c.b16 %v1038_v20, %v1038_v20 }
 0x1a0   : > { %1332 = vmatpush.bf16.msra.mxu1 %v3627_v1  ;;  %v1043_v1 = vpack.c.b16 %v1037_v35, %v1037_v35 }
 0x1a4   : > { %1333 = vmatpush.bf16.msra.mxu1 %v3634_v5 }
 0x1a7   : > { %975 = vmatmul.bf16.vlgmr.msra.gmra.mxu2 %v2878_v54 }
 0x1a8   : > { %1085 = vmatpush.bf16.msra.mxu2 %v3683_v32  ;;  %v706_v27 = vpop.f32.mrf.mxu1  ;;  %1334 = vmatpush.bf16.msra.mxu1 %v3651_v12  ;;  %v3358_v12 = vld [vmem:[%s4473_s3 + $0xcc] sm:$0xf] }
 0x1a9   : > { %v2930_v51 = vor.u32 %v3358_v12, %v2927_v46 }
 0x1ab   : > { %1075 = vmatmul.bf16.gmra.mxu3 %v1043_v1  ;;  %1155 = vmatmul.bf16.vlgmr.msrb.gmra.mxu1 %v2926_v39  ;;  %v3366_v1 = vld [vmem:[%s4473_s3 + $0x11c] sm:$0xf] }
 0x1ac   : > { %1086 = vmatpush.bf16.msra.mxu2 %v3691_v36 }
 0x1ae   : > { %v3867_v5 = vpop.f32.mrf.mxu3 }
 0x1b0   : > { %1087 = vmatpush.bf16.msra.mxu2 %v3711_v42  ;;  %v708_v44 = vpop.f32.mrf.mxu1 }
 0x1b6   : > { %v3882_v47 = vpop.f32.mrf.mxu3 }
 0x1b7   : > { %980 = vmatmul.bf16.gmra.mxu2 %v2886_v45 }
 0x1b8   : > { %v711_v52 = vpop.f32.mrf.mxu1 }
 0x1bb   : > { %2939 = vmatmul.msk.bf16.vlgmr.msrb.gmra.mxu3 %vm687_vm1, %v2930_v51  ;;  %1160 = vmatmul.bf16.gmra.mxu1 %v2934_v53 }
 0x1be   : > { %v3894_v56 = vpop.f32.mrf.mxu3 }
 0x1c0   : > { %v713_v58 = vpop.f32.mrf.mxu1 }
 0x1c6   : > { %v3905_v2 = vpop.f32.mrf.mxu3 }
 0x1c7   : > { %985 = vmatmul.bf16.gmra.mxu2 %v953_v60 }
 0x1c8   : > { %v716_v4 = vpop.f32.mrf.mxu1 }
 0x1ca   : > { %v729_v7 = vpop.f32.mrf.mxu2 }
 0x1cb   : > { %v730_v8 = vadd.f32 %v729_v7, %v706_v27  ;;  %2940 = vmatmul.msk.bf16.gmra.mxu3 %vm687_vm1, %v2938_v3  ;;  %1165 = vmatmul.bf16.gmra.mxu1 %v1133_v6  ;;  %v2975_v27 = vld [vmem:[%s4473_s3 + $0x120] sm:$0xf0]  ;;  %v3363_v7 = vld [vmem:[%s4473_s3 + $0xf4] sm:$0xf0] }
 0x1cc   : > { %v2978_v49 = vor.u32 %v3366_v1, %v2975_v27 }
 0x1cd   : > { %v743_v15 = vpack.c.bf16 %v730_v8, %v730_v8  ;;  %v3368_v8 = vld [vmem:[%s4473_s3 + $0x12c] sm:$0xf] }
 0x1ce   : > { %v3908_v9 = vpop.f32.mrf.mxu3 }
 0x1cf   : > { %v3916_v22 = vunpack.c.l.b16 %v743_v15 }
 0x1d0   : > { %v718_v11 = vpop.f32.mrf.mxu1 }
 0x1d2   : > { %v731_v13 = vpop.f32.mrf.mxu2 }
 0x1d3   : > { %v732_v16 = vadd.f32 %v731_v13, %v708_v44  ;;  %v3369_v44 = vld [vmem:[%s4473_s3 + $0x12c] sm:$0xf0]  ;;  %v2970_v13 = vld [vmem:[%s4473_s3 + $0x138] sm:$0x33] }
 0x1d4   : > { %v1307_v15 = vunpack.c.l.b16 %v2970_v13 }
 0x1d5   : > { %v744_v18 = vpack.c.bf16 %v732_v16, %v732_v16  ;;  %v2986_v16 = vor.u32 %v3368_v8, %v2983_v10 }
 0x1d6   : > { %v808_v19 = vpop.f32.mrf.mxu3 }
 0x1d7   : > { %v3918_v23 = vunpack.c.l.b16 %v744_v18  ;;  %2893 = vmatmul.msk.bf16.vlgmr.msrb.gmra.mxu2 %vm687_vm1, %v954_v14  ;;  %v1313_v18 = vpack.c.b16 %v1307_v15, %v1307_v15 }
 0x1d8   : > { %1265 = vmatpush.bf16.msrb.mxu2 %v3683_v32  ;;  %v886_v26 = vpop.f32.mrf.mxu1 }
 0x1d9   : > { %v1478_v25 = vpack.c.b16 %v3918_v23, %v3916_v22 }
 0x1da   : > { %v734_v37 = vpop.f32.mrf.mxu2 }
 0x1db   : > { %v735_v29 = vadd.f32 %v734_v37, %v711_v52  ;;  %2941 = vmatmul.msk.bf16.gmra.mxu3 %vm687_vm1, %v1134_v24  ;;  %1335 = vmatmul.bf16.vlgmr.msra.gmra.mxu1 %v2974_v28  ;;  %v2982_v52 = vor.u32 %v3369_v44, %v2981_v41  ;;  %v2951_v41 = vld [vmem:[%s4473_s3 + $0xf8] sm:$0xf0] }
 0x1dc   : > { %1266 = vmatpush.bf16.msrb.mxu2 %v3691_v36 }
 0x1dd   : > { %v745_v54 = vpack.c.bf16 %v735_v29, %v735_v29  ;;  %v2957_v29 = vld [vmem:[%s4473_s3 + $0x100] sm:$0xf] }
 0x1de   : > { %v909_v43 = vpop.f32.mrf.mxu3 }
 0x1df   : > { %v910_v40 = vadd.f32 %v909_v43, %v886_v26  ;;  %v3945_v45 = vunpack.c.l.b16 %v745_v54  ;;  %v3365_v43 = vld [vmem:[%s4473_s3 + $0x104] sm:$0xf0] }
 0x1e0   : > { %1267 = vmatpush.bf16.msrb.mxu2 %v3711_v42  ;;  %v888_v48 = vpop.f32.mrf.mxu1  ;;  %v2958_v34 = vor.u32 %v3365_v43, %v2957_v29 }
 0x1e1   : > { %v923_v55 = vpack.c.bf16 %v910_v40, %v910_v40  ;;  %v3362_v40 = vld [vmem:[%s4473_s3 + $0xf4] sm:$0xf] }
 0x1e2   : > { %v736_v33 = vpop.f32.mrf.mxu2 }
 0x1e3   : > { %v737_v35 = vadd.f32 %v736_v33, %v713_v58  ;;  %v1505_v60 = vunpack.c.l.b16 %v923_v55  ;;  %v1308_v33 = vunpack.c.h.b16 %v2970_v13  ;;  %v2946_v55 = vld [vmem:[%s4473_s3 + $0x110] sm:$0x33] }
 0x1e5   : > { %v746_v38 = vpack.c.bf16 %v737_v35, %v737_v35 }
 0x1e6   : > { %v911_v39 = vpop.f32.mrf.mxu3 }
 0x1e7   : > { %v3947_v12 = vunpack.c.l.b16 %v746_v38  ;;  %2915 = vmatmul.msk.bf16.vlgmr.msra.gmra.mxu2 %vm687_vm1, %v2906_v59  ;;  %v912_v46 = vadd.f32 %v911_v39, %v888_v48  ;;  %v1314_v38 = vpack.c.b16 %v1308_v33, %v1308_v33 }
 0x1e8   : > { %1445 = vmatpush.bf16.msra.mxu2 %v3683_v32  ;;  %v891_v51 = vpop.f32.mrf.mxu1  ;;  %v3356_v32 = vld [vmem:[%s4473_s3 + $0xb4] sm:$0xf] }
 0x1e9   : > { %v1479_v50 = vpack.c.b16 %v3947_v12, %v3945_v45  ;;  %v924_v57 = vpack.c.bf16 %v912_v46, %v912_v46  ;;  %v2914_v6 = vor.u32 %v3356_v32, %v2911_v63  ;;  %v2959_v32 = vld [vmem:[%s4473_s3 + $0x108] sm:$0xf0] }
 0x1ea   : > { %v739_v53 = vpop.f32.mrf.mxu2 }
 0x1eb   : > { %v3953_v58 = vadd.f32 %v739_v53, %v716_v4  ;;  %2987 = vmatmul.msk.bf16.vlgmr.msra.gmra.mxu3 %vm687_vm1, %v2978_v49  ;;  %1340 = vmatmul.bf16.gmra.mxu1 %v2982_v52  ;;  %v1506_v61 = vunpack.c.l.b16 %v924_v57  ;;  %v2954_v49 = vor.u32 %v3362_v40, %v2951_v41  ;;  %v1217_v57 = vunpack.c.l.b16 %v2946_v55 }
 0x1ec   : > { %1446 = vmatpush.bf16.msra.mxu2 %v3691_v36 }
 0x1ed   : > { %v1510_v36 = vpack.c.b16 %v1506_v61, %v1505_v60  ;;  %v1223_v60 = vpack.c.b16 %v1217_v57, %v1217_v57 }
 0x1ee   : > { %v914_v62 = vpop.f32.mrf.mxu3 }
 0x1ef   : > { %v3964_v0 = vadd.f32 %v914_v62, %v891_v51  ;;  %1513 = vrot.lane.b32.xlu2 %v1510_v36, %s3472_s18  ;;  %v3364_v62 = vld [vmem:[%s4473_s3 + $0x104] sm:$0xf] }
 0x1f0   : > { %1447 = vmatpush.bf16.msra.mxu2 %v3711_v42  ;;  %v3966_v3 = vpop.f32.mrf.mxu1  ;;  %v2949_v42 = vld [vmem:[%s4473_s3 + $0xf0] sm:$0xf]  ;;  %v2962_v36 = vor.u32 %v3364_v62, %v2959_v32 }
 0x1f1   : > { %v2950_v11 = vor.u32 %v3363_v7, %v2949_v42 }
 0x1f2   : > { %v741_v4 = vpop.f32.mrf.mxu2 }
 0x1f3   : > { %1245 = vmatmul.bf16.vlgmr.msrb.gmra.mxu0 %v2950_v11  ;;  %v1218_v11 = vunpack.c.h.b16 %v2946_v55 }
 0x1f6   : > { %v3984_v14 = vpop.f32.mrf.mxu3 }
 0x1f7   : > { %2916 = vmatmul.msk.bf16.gmra.mxu2 %vm687_vm1, %v2914_v6 }
 0x1f8   : > { %v896_v17 = vpop.f32.mrf.mxu1 }
 0x1fa   : > { %v819_v19 = vpop.f32.mrf.mxu2 }
 0x1fb   : > { %2988 = vmatmul.msk.bf16.gmra.mxu3 %vm687_vm1, %v2986_v16  ;;  %1345 = vmatmul.bf16.gmra.mxu1 %v1313_v18  ;;  %v820_v21 = vadd.f32 %v819_v19, %v3867_v5  ;;  %v1224_v18 = vpack.c.b16 %v1218_v11, %v1218_v11 }
 0x1fd   : > { %v833_v31 = vpack.c.bf16 %v820_v21, %v820_v21 }
 0x1fe   : > { %v919_v24 = vpop.f32.mrf.mxu3 }
 0x1ff   : > { %v3990_v26 = vadd.f32 %v919_v24, %v896_v17  ;;  %v3999_v54 = vunpack.c.l.b16 %v833_v31 }
 0x200   : > { %v898_v28 = vpop.f32.mrf.mxu1 }
 0x202   : > { %v821_v37 = vpop.f32.mrf.mxu2 }
 0x203   : > { %v822_v48 = vadd.f32 %v821_v37, %v3882_v47  ;;  %1250 = vmatmul.bf16.gmra.mxu0 %v2958_v34 }
 0x205   : > { %v834_v5 = vpack.c.bf16 %v822_v48, %v822_v48 }
 0x206   : > { %v921_v59 = vpop.f32.mrf.mxu3 }
 0x207   : > { %v4001_v35 = vunpack.c.l.b16 %v834_v5  ;;  %2917 = vmatmul.msk.bf16.gmra.mxu2 %vm687_vm1, %v1044_v30 }
 0x208   : > { %v999_v1 = vpop.f32.mrf.mxu1 }
 0x209   : > { %v1491_v27 = vpack.c.b16 %v4001_v35, %v3999_v54 }
 0x20a   : > { %v4006_v39 = vpop.f32.mrf.mxu2 }
 0x20b   : > { %2989 = vmatmul.msk.bf16.gmra.mxu3 %vm687_vm1, %v1314_v38 }
 0x20e   : > { %v4009_v47 = vpop.f32.mrf.mxu3 }
 0x210   : > { %v1001_v44 = vpop.f32.mrf.mxu1 }
 0x212   : > { %v4017_v46 = vpop.f32.mrf.mxu2 }
 0x213   : > { %1255 = vmatmul.bf16.gmra.mxu0 %v1223_v60 }
 0x216   : > { %v4019_v51 = vpop.f32.mrf.mxu3 }
 0x217   : > { %2963 = vmatmul.msk.bf16.vlgmr.msrb.gmra.mxu2 %vm687_vm1, %v2954_v49 }
 0x218   : > { %v1004_v52 = vpop.f32.mrf.mxu1 }
 0x21a   : > { %v4022_v53 = vpop.f32.mrf.mxu2 }
 0x21e   : > { %v4027_v61 = vpop.f32.mrf.mxu3 }
 0x220   : > { %v4035_v63 = vpop.f32.mrf.mxu1 }
 0x222   : > { %v831_v4 = vpop.f32.mrf.mxu2 }
 0x226   : > { %v4037_v6 = vpop.f32.mrf.mxu3 }
 0x227   : > { %2964 = vmatmul.msk.bf16.gmra.mxu2 %vm687_vm1, %v2962_v36 }
 0x228   : > { %v1156_v7 = vpop.f32.mrf.mxu1 }
 0x22a   : > { %v976_v42 = vpop.f32.mrf.mxu2 }
 0x22b   : > { %v1000_v8 = vadd.f32 %v999_v1, %v976_v42 }
 0x22d   : > { %v1013_v16 = vpack.c.bf16 %v1000_v8, %v1000_v8 }
 0x22e   : > { %v4040_v10 = vpop.f32.mrf.mxu3 }
 0x22f   : > { %v1524_v20 = vunpack.c.l.b16 %v1013_v16 }
 0x230   : > { %v1158_v15 = vpop.f32.mrf.mxu1 }
 0x232   : > { %v978_v13 = vpop.f32.mrf.mxu2 }
 0x233   : > { %v1002_v17 = vadd.f32 %v1001_v44, %v978_v13 }
 0x235   : > { %v1014_v19 = vpack.c.bf16 %v1002_v17, %v1002_v17 }
 0x236   : > { %v1078_v24 = vpop.f32.mrf.mxu3 }
 0x237   : > { %v1525_v21 = vunpack.c.l.b16 %v1014_v19  ;;  %2965 = vmatmul.msk.bf16.gmra.mxu2 %vm687_vm1, %v1224_v18  ;;  %v2999_v24 = vld [vmem:[%s4473_s3 + $0x148] sm:$0xf0] }
 0x238   : > { %v1161_v29 = vpop.f32.mrf.mxu1 }
 0x239   : > { %v1529_v28 = vpack.c.b16 %v1525_v21, %v1524_v20  ;;  %v3370_v21 = vld [vmem:[%s4473_s3 + $0x144] sm:$0xf] }
 0x23a   : > { %v981_v37 = vpop.f32.mrf.mxu2 }
 0x23b   : > { %v4043_v43 = vadd.f32 %v1004_v52, %v981_v37  ;;  %1532 = vrot.lane.b32.xlu2 %v1529_v28, %s3473_s14  ;;  %v3002_v28 = vor.u32 %v3370_v21, %v2999_v24 }
 0x23e   : > { %v1179_v30 = vpop.f32.mrf.mxu3 }
 0x23f   : > { %v1180_v31 = vadd.f32 %v1179_v30, %v1156_v7  ;;  %v2997_v30 = vld [vmem:[%s4473_s3 + $0x140] sm:$0xf] }
 0x240   : > { %v1163_v34 = vpop.f32.mrf.mxu1 }
 0x241   : > { %v1193_v33 = vpack.c.bf16 %v1180_v31, %v1180_v31  ;;  %v3371_v31 = vld [vmem:[%s4473_s3 + $0x144] sm:$0xf0] }
 0x242   : > { %v4046_v48 = vpop.f32.mrf.mxu2 }
 0x243   : > { %v1556_v38 = vunpack.c.l.b16 %v1193_v33 }
 0x246   : > { %v1181_v5 = vpop.f32.mrf.mxu3 }
 0x247   : > { %v1182_v59 = vadd.f32 %v1181_v5, %v1158_v15  ;;  %3011 = vmatmul.msk.bf16.vlgmr.msra.gmra.mxu2 %vm687_vm1, %v3002_v28 }
 0x248   : > { %v1166_v41 = vpop.f32.mrf.mxu1 }
 0x249   : > { %v1194_v1 = vpack.c.bf16 %v1182_v59, %v1182_v59 }
 0x24a   : > { %v986_v40 = vpop.f32.mrf.mxu2 }
 0x24b   : > { %v1557_v44 = vunpack.c.l.b16 %v1194_v1 }
 0x24d   : > { %v1561_v49 = vpack.c.b16 %v1557_v44, %v1556_v38  ;;  %v3372_v44 = vld [vmem:[%s4473_s3 + $0x154] sm:$0xf] }
 0x24e   : > { %v1184_v55 = vpop.f32.mrf.mxu3 }
 0x24f   : > { %v1185_v52 = vadd.f32 %v1184_v55, %v1161_v29  ;;  %1564 = vrot.lane.b32.xlu0 %v1561_v49, %s3474_s15  ;;  %v3007_v49 = vld [vmem:[%s4473_s3 + $0x158] sm:$0xf0] }
 0x250   : > { %v1168_v60 = vpop.f32.mrf.mxu1 }
 0x251   : > { %v1195_v62 = vpack.c.bf16 %v1185_v52, %v1185_v52  ;;  %v3010_v52 = vor.u32 %v3372_v44, %v3007_v49 }
 0x252   : > { %v988_v57 = vpop.f32.mrf.mxu2 }
 0x253   : > { %v4049_v36 = vunpack.c.l.b16 %v1195_v62 }
 0x256   : > { %v1186_v32 = vpop.f32.mrf.mxu3 }
 0x257   : > { %v1187_v4 = vadd.f32 %v1186_v32, %v1163_v34  ;;  %v2998_v34 = vor.u32 %v3371_v31, %v2997_v30  ;;  %3012 = vmatmul.msk.bf16.gmra.mxu2 %vm687_vm1, %v3010_v52 }
 0x258   : > { %v1336_v8 = vpop.f32.mrf.mxu1 }
 0x259   : > { %v1196_v42 = vpack.c.bf16 %v1187_v4, %v1187_v4  ;;  %1425 = vmatmul.bf16.vlgmr.msra.gmra.mxu0 %v2998_v34  ;;  %v1007_v34 = vadd.f32 %v4035_v63, %v4046_v48  ;;  %v2994_v48 = vld [vmem:[%s4473_s3 + $0x160] sm:$0x33] }
 0x25a   : > { %v1009_v7 = vpop.f32.mrf.mxu2 }
 0x25b   : > { %v4051_v11 = vadd.f32 %v1009_v7, %v986_v40  ;;  %v4053_v13 = vunpack.c.l.b16 %v1196_v42  ;;  %v3005_v42 = vld [vmem:[%s4473_s3 + $0x150] sm:$0xf]  ;;  %v3373_v7 = vld [vmem:[%s4473_s3 + $0x154] sm:$0xf0]  ;;  %v1016_v44 = vpack.c.bf16 %v1007_v34, %v1007_v34 }
 0x25d   : > { %v1562_v15 = vpack.c.b16 %v4053_v13, %v4049_v36  ;;  %v1527_v54 = vunpack.c.l.b16 %v1016_v44  ;;  %v925_v36 = vpack.c.bf16 %v3964_v0, %v3964_v0  ;;  %v830_v0 = vadd.f32 %v4022_v53, %v3908_v9  ;;  %v3378_v9 = vld [vmem:[%s4474_s4 + $0x20] sm:$0xff]  ;;  %v3377_v53 = vld [vmem:[%s4474_s4 + $0x18] sm:$0xff] }
 0x25e   : > { %v1189_v16 = vpop.f32.mrf.mxu3 }
 0x25f   : > { %v4057_v17 = vadd.f32 %v1189_v16, %v1166_v41  ;;  %v3006_v16 = vor.u32 %v3373_v7, %v3005_v42 }
 0x260   : > { %v1338_v19 = vpop.f32.mrf.mxu1 }
 0x262   : > { %v1011_v18 = vpop.f32.mrf.mxu2 }
 0x266   : > { %v1191_v20 = vpop.f32.mrf.mxu3 }
 0x268   : > { %v1341_v29 = vpop.f32.mrf.mxu1 }
 0x269   : > { %1430 = vmatmul.bf16.gmra.mxu0 %v3006_v16 }
 0x26a   : > { %v4065_v37 = vpop.f32.mrf.mxu2 }
 0x26e   : > { %v1359_v33 = vpop.f32.mrf.mxu3 }
 0x26f   : > { %v1360_v5 = vadd.f32 %v1359_v33, %v1336_v8 }
 0x270   : > { %v1343_v38 = vpop.f32.mrf.mxu1  ;;  %v1246_v40 = vpop.f32.mrf.mxu0 }
 0x271   : > { %v1373_v1 = vpack.c.bf16 %v1360_v5, %v1360_v5 }
 0x272   : > { %v4074_v59 = vpop.f32.mrf.mxu2 }
 0x273   : > { %v1594_v57 = vunpack.c.l.b16 %v1373_v1 }
 0x276   : > { %v1361_v41 = vpop.f32.mrf.mxu3 }
 0x277   : > { %v1362_v55 = vadd.f32 %v1361_v41, %v1338_v19 }
 0x278   : > { %v1346_v32 = vpop.f32.mrf.mxu1  ;;  %v1248_v19 = vpop.f32.mrf.mxu0 }
 0x279   : > { %v1374_v60 = vpack.c.bf16 %v1362_v55, %v1362_v55 }
 0x27a   : > { %v4082_v62 = vpop.f32.mrf.mxu2 }
 0x27b   : > { %v1595_v4 = vunpack.c.l.b16 %v1374_v60 }
 0x27d   : > { %v1599_v8 = vpack.c.b16 %v1595_v4, %v1594_v57  ;;  %v1398_v4 = vunpack.c.h.b16 %v2994_v48 }
 0x27e   : > { %v1364_v18 = vpop.f32.mrf.mxu3 }
 0x27f   : > { %1602 = vrot.lane.b32.xlu1 %v1599_v8, %s3473_s14  ;;  %v1365_v20 = vadd.f32 %v1364_v18, %v1341_v29  ;;  %v1404_v8 = vpack.c.b16 %v1398_v4, %v1398_v4  ;;  %v1397_v18 = vunpack.c.l.b16 %v2994_v48 }
 0x280   : > { %v1348_v24 = vpop.f32.mrf.mxu1  ;;  %v1251_v41 = vpop.f32.mrf.mxu0 }
 0x281   : > { %v1375_v28 = vpack.c.bf16 %v1365_v20, %v1365_v20  ;;  %3013 = vmatmul.msk.bf16.gmra.mxu2 %vm687_vm1, %v1404_v8  ;;  %v1017_v20 = vpack.c.bf16 %v4051_v11, %v4051_v11  ;;  %v1403_v24 = vpack.c.b16 %v1397_v18, %v1397_v18  ;;  %v827_v11 = vadd.f32 %v4017_v46, %v3905_v2 }
 0x282   : > { %v4092_v21 = vpop.f32.mrf.mxu2  ;;  %v917_v2 = vadd.f32 %v3984_v14, %v3966_v3  ;;  %v3379_v3 = vld [vmem:[%s4474_s4 + $0x28] sm:$0xff] }
 0x283   : > { %v1596_v33 = vunpack.c.l.b16 %v1375_v28  ;;  %1435 = vmatmul.bf16.gmra.mxu0 %v1403_v24 }
 0x284   : > { %v926_v13 = vpack.c.bf16 %v917_v2, %v917_v2 }
 0x286   : > { %v1366_v30 = vpop.f32.mrf.mxu3 }
 0x287   : > { %v1367_v31 = vadd.f32 %v1366_v30, %v1343_v38  ;;  %1494 = vrot.lane.b32.xlu1 %v1491_v27, %s3474_s15  ;;  %v1015_v38 = vpack.c.bf16 %v4043_v43, %v4043_v43  ;;  %v1528_v30 = vunpack.c.l.b16 %v1017_v20  ;;  %v837_v20 = vpack.c.bf16 %v830_v0, %v830_v0 }
 0x288   : > { %v1253_v63 = vpop.f32.mrf.mxu0 }
 0x289   : > { %v1376_v5 = vpack.c.bf16 %v1367_v31, %v1367_v31  ;;  %v1526_v27 = vunpack.c.l.b16 %v1015_v38  ;;  %v1531_v44 = vpack.c.b16 %v1528_v30, %v1528_v30 }
 0x28a   : > { %v4100_v1 = vpop.f32.mrf.mxu2 }
 0x28b   : > { %v1597_v29 = vunpack.c.l.b16 %v1376_v5  ;;  %v1530_v60 = vpack.c.b16 %v1527_v54, %v1526_v27 }
 0x28d   : > { %v1600_v49 = vpack.c.b16 %v1597_v29, %v1596_v33 }
 0x28e   : > { %v1369_v55 = vpop.f32.mrf.mxu3 }
 0x28f   : > { %1604 = vrot.lane.b32.xlu2 %v1600_v49, %s3473_s14  ;;  %v1370_v52 = vadd.f32 %v1369_v55, %v1346_v32 }
 0x290   : > { %v1256_v16 = vpop.f32.mrf.mxu0 }
 0x291   : > { %v1377_v57 = vpack.c.bf16 %v1370_v52, %v1370_v52 }
 0x292   : > { %v1101_v35 = vpop.f32.mrf.mxu2 }
 0x293   : > { %v1598_v7 = vunpack.c.l.b16 %v1377_v57  ;;  %v836_v35 = vpack.c.bf16 %v827_v11, %v827_v11  ;;  %v3391_v11 = vld [vmem:[%s4474_s4 + $0x88] sm:$0xff] }
 0x294   : > { %1881 = vmatpush.bf16.msrb.mxu0 %v3391_v11  ;;  %v1097_v11 = vadd.f32 %v4092_v21, %v4037_v6 }
 0x295   : > { %v1601_v32 = vpack.c.b16 %v1598_v7, %v1598_v7  ;;  %v1489_v46 = vunpack.c.l.b16 %v836_v35  ;;  %v3386_v35 = vld [vmem:[%s4474_s4 + $0x60] sm:$0xff] }
 0x296   : > { %v1371_v42 = vpop.f32.mrf.mxu3 }
 0x297   : > { %1534 = vrot.lane.b32.xlu2 %v1530_v60, %s3473_s14  ;;  %v3381_v60 = vld [vmem:[%s4474_s4 + $0x38] sm:$0xff] }
 0x298   : > { %v1258_v5 = vpop.f32.mrf.mxu0  ;;  %1829 = vmatpush.bf16.msrb.mxu1 %v3381_v60  ;;  %v3384_v60 = vld [vmem:[%s4474_s4 + $0x50] sm:$0xff] }
 0x29a   : > { %v1269_v43 = vpop.f32.mrf.mxu2 }
 0x29b   : > { %v1270_v28 = vadd.f32 %v1269_v43, %v1246_v40  ;;  %v825_v40 = vadd.f32 %v4006_v39, %v3894_v56  ;;  %v3380_v39 = vld [vmem:[%s4474_s4 + $0x30] sm:$0xff]  ;;  %v1507_v43 = vunpack.c.l.b16 %v925_v36 }
 0x29c   : > { %1830 = vmatpush.bf16.msrb.mxu1 %v3380_v39  ;;  %v3383_v39 = vld [vmem:[%s4474_s4 + $0x48] sm:$0xff] }
 0x29d   : > { %v1283_v34 = vpack.c.bf16 %v1270_v28, %v1270_v28  ;;  %v835_v27 = vpack.c.bf16 %v825_v40, %v825_v40  ;;  %v3387_v40 = vld [vmem:[%s4474_s4 + $0x68] sm:$0xff] }
 0x29f   : > { %1606 = vrot.lane.b32.xlu2 %v1601_v32, %s3473_s14  ;;  %v1575_v49 = vunpack.c.l.b16 %v1283_v34  ;;  %v1508_v32 = vunpack.c.l.b16 %v926_v13 }
 0x2a0   : > { %1831 = vmatpush.bf16.msrb.mxu1 %v3379_v3 }
 0x2a1   : > { %v1511_v28 = vpack.c.b16 %v1508_v32, %v1507_v43 }
 0x2a2   : > { %v1271_v31 = vpop.f32.mrf.mxu2 }
 0x2a3   : > { %v1272_v33 = vadd.f32 %v1271_v31, %v1248_v19 }
 0x2a4   : > { %1832 = vmatpush.bf16.msrb.mxu1 %v3378_v9 }
 0x2a5   : > { %v1284_v29 = vpack.c.bf16 %v1272_v33, %v1272_v33  ;;  %v927_v33 = vpack.c.bf16 %v3990_v26, %v3990_v26  ;;  %v3376_v26 = vld [vmem:[%s4474_s4 + $0x10] sm:$0xff] }
 0x2a7   : > { %v1576_v55 = vunpack.c.l.b16 %v1284_v29  ;;  %1536 = vrot.lane.b32.xlu2 %v1531_v44, %s3473_s14  ;;  %v1509_v29 = vunpack.c.l.b16 %v927_v33 }
 0x2a8   : > { %1833 = vmatpush.bf16.msrb.mxu1 %v3377_v53 }
 0x2a9   : > { %v1580_v38 = vpack.c.b16 %v1576_v55, %v1575_v49  ;;  %v1512_v44 = vpack.c.b16 %v1509_v29, %v1509_v29  ;;  %v3375_v49 = vld [vmem:[%s4474_s4 + $0x8] sm:$0xff]  ;;  %v3374_v55 = vld [vmem:[%s4474_s4] sm:$0xff] }
 0x2aa   : > { %v1274_v52 = vpop.f32.mrf.mxu2 }
 0x2ab   : > { %1583 = vrot.lane.b32.xlu0 %v1580_v38, %s3472_s18  ;;  %v1275_v54 = vadd.f32 %v1274_v52, %v1251_v41  ;;  %v1488_v41 = vunpack.c.l.b16 %v835_v27  ;;  %v3389_v38 = vld [vmem:[%s4474_s4 + $0x78] sm:$0xff]  ;;  %v3388_v52 = vld [vmem:[%s4474_s4 + $0x70] sm:$0xff] }
 0x2ac   : > { %1834 = vmatpush.bf16.msrb.mxu1 %v3376_v26  ;;  %1852 = vmatpush.bf16.msrb.mxu3 %v3389_v38 }
 0x2ad   : > { %v1285_v57 = vpack.c.bf16 %v1275_v54, %v1275_v54  ;;  %v1492_v7 = vpack.c.b16 %v1489_v46, %v1488_v41  ;;  %v3390_v54 = vld [vmem:[%s4474_s4 + $0x80] sm:$0xff]  ;;  %v1514_v46 = vpop.permute.xlu2 %1513 }
 0x2ae   : > { %1882 = vmatpush.bf16.msrb.mxu0 %v3390_v54 }
 0x2b0   : > { %1835 = vmatpush.bf16.msrb.mxu1 %v3375_v49  ;;  %1853 = vmatpush.bf16.msrb.mxu3 %v3388_v52 }
 0x2b2   : > { %v1276_v19 = vpop.f32.mrf.mxu2 }
 0x2b3   : > { %v1277_v48 = vadd.f32 %v1276_v19, %v1253_v63  ;;  %1566 = vrot.lane.b32.xlu0 %v1562_v15, %s3474_s15  ;;  %v1577_v63 = vunpack.c.l.b16 %v1285_v57  ;;  %v1197_v15 = vpack.c.bf16 %v4057_v17, %v4057_v17  ;;  %v3385_v19 = vld [vmem:[%s4474_s4 + $0x58] sm:$0xff] }
 0x2b4   : > { %1836 = vmatpush.bf16.msrb.mxu1 %v3374_v55  ;;  %1854 = vmatpush.bf16.msrb.mxu3 %v3387_v40  ;;  %v1106_v40 = vpack.c.bf16 %v1097_v11, %v1097_v11 }
 0x2b5   : > { %v1286_v56 = vpack.c.bf16 %v1277_v48, %v1277_v48  ;;  %v1560_v18 = vunpack.c.l.b16 %v1197_v15  ;;  %v3382_v15 = vld [vmem:[%s4474_s4 + $0x40] sm:$0xff] }
 0x2b7   : > { %v1578_v4 = vunpack.c.l.b16 %v1286_v56  ;;  %v1563_v24 = vpack.c.b16 %v1560_v18, %v1560_v18 }
 0x2b8   : > { %1855 = vmatpush.bf16.msrb.mxu3 %v3386_v35 }
 0x2b9   : > { %v1581_v42 = vpack.c.b16 %v1578_v4, %v1577_v63 }
 0x2ba   : > { %v1279_v14 = vpop.f32.mrf.mxu2 }
 0x2bb   : > { %v1280_v8 = vadd.f32 %v1279_v14, %v1256_v16  ;;  %1496 = vrot.lane.b32.xlu0 %v1492_v7, %s3474_s15  ;;  %1585 = vrot.lane.b32.xlu1 %v1581_v42, %s3472_s18  ;;  %v1490_v16 = vunpack.c.l.b16 %v837_v20  ;;  %v1533_v14 = vpop.permute.xlu2 %1532 }
 0x2bc   : > { %1856 = vmatpush.bf16.msrb.mxu3 %v3385_v19 }
 0x2bd   : > { %v1287_v17 = vpack.c.bf16 %v1280_v8, %v1280_v8  ;;  %v1493_v5 = vpack.c.b16 %v1490_v16, %v1490_v16  ;;  %v1092_v16 = vadd.f32 %v4074_v59, %v4019_v51 }
 0x2bf   : > { %v1579_v31 = vunpack.c.l.b16 %v1287_v17  ;;  %v1104_v33 = vpack.c.bf16 %v1092_v16, %v1092_v16 }
 0x2c0   : > { %1857 = vmatpush.bf16.msrb.mxu3 %v3384_v60  ;;  %v1546_v60 = vunpack.c.l.b16 %v1106_v40 }
 0x2c1   : > { %v1582_v34 = vpack.c.b16 %v1579_v31, %v1579_v31  ;;  %v1565_v9 = vpop.permute.xlu0 %1564  ;;  %v1544_v53 = vunpack.c.l.b16 %v1104_v33 }
 0x2c2   : > { %v1281_v30 = vpop.f32.mrf.mxu2 }
 0x2c3   : > { %1568 = vrot.lane.b32.xlu0 %v1563_v24, %s3474_s15  ;;  %1515 = vrot.lane.b32.xlu1 %v1511_v28, %s3472_s18 }
 0x2c4   : > { %1858 = vmatpush.bf16.msrb.mxu3 %v3383_v39 }
 0x2c8   : > { %1859 = vmatpush.bf16.msrb.mxu3 %v3382_v15 }
 0x2ca   : > { %v1449_v57 = vpop.f32.mrf.mxu2 }
 0x2cb   : > { %1498 = vrot.lane.b32.xlu0 %v1493_v5, %s3474_s15  ;;  %1587 = vrot.lane.b32.xlu1 %v1582_v34, %s3472_s18  ;;  %v1090_v34 = vadd.f32 %v4065_v37, %v4009_v47  ;;  %v1095_v47 = vadd.f32 %v4082_v62, %v4027_v61  ;;  %v1100_v62 = vadd.f32 %v4100_v1, %v4040_v10 }
 0x2cc   : > { %v747_v10 = vpack.c.bf16 %v3953_v58, %v3953_v58 }
 0x2cd   : > { %v1103_v5 = vpack.c.bf16 %v1090_v34, %v1090_v34  ;;  %v1105_v35 = vpack.c.bf16 %v1095_v47, %v1095_v47 }
 0x2ce   : > { %v1477_v12 = vunpack.c.l.b16 %v747_v10  ;;  %v3096_v10 = vld [vmem:[%s4476_s6 + $0x8] sm:$0x3] }
 0x2cf   : > { %v1543_v29 = vunpack.c.l.b16 %v1103_v5  ;;  %v1545_v6 = vunpack.c.l.b16 %v1105_v35 }
 0x2d1   : > { %v1549_v21 = vpack.c.b16 %v1546_v60, %v1545_v6 }
 0x2d2   : > { %v1451_v63 = vpop.f32.mrf.mxu2 }
 0x2d3   : > { %1517 = vrot.lane.b32.xlu1 %v1512_v44, %s3472_s18  ;;  %v1548_v44 = vpack.c.b16 %v1544_v53, %v1543_v29 }
 0x2d5   : > { %v1650_v26 = vsel %vm1621_vm3, %v1548_v44, %v1565_v9 }
 0x2d6   : > { %v1426_v27 = vpop.f32.mrf.mxu0 }
 0x2d7   : > { %v1450_v48 = vadd.f32 %v1449_v57, %v1426_v27 }
 0x2d9   : > { %v1463_v56 = vpack.c.bf16 %v1450_v48, %v1450_v48 }
 0x2da   : > { %v1454_v18 = vpop.f32.mrf.mxu2 }
 0x2db   : > { %v1613_v36 = vunpack.c.l.b16 %v1463_v56 }
 0x2de   : > { %v1428_v41 = vpop.f32.mrf.mxu0 }
 0x2df   : > { %v1452_v4 = vadd.f32 %v1451_v63, %v1428_v41 }
 0x2e1   : > { %v1464_v13 = vpack.c.bf16 %v1452_v4, %v1452_v4  ;;  %v1107_v4 = vpack.c.bf16 %v1100_v62, %v1100_v62 }
 0x2e2   : > { %v1456_v28 = vpop.f32.mrf.mxu2 }
 0x2e3   : > { %v1614_v7 = vunpack.c.l.b16 %v1464_v13 }
 0x2e5   : > { %v1618_v43 = vpack.c.b16 %v1614_v7, %v1613_v36 }
 0x2e6   : > { %v1431_v0 = vpop.f32.mrf.mxu0 }
 0x2e7   : > { %3086 = vmatmul.msk.bf16.vlgmr.msrb.gmra.mxu0 %vm1621_vm3, %v1618_v43  ;;  %v1455_v17 = vadd.f32 %v1454_v18, %v1431_v0  ;;  %v1480_v0 = vpack.c.b16 %v1477_v12, %v1477_v12 }
 0x2e9   : > { %v1465_v20 = vpack.c.bf16 %v1455_v17, %v1455_v17 }
 0x2eb   : > { %v1615_v22 = vunpack.c.l.b16 %v1465_v20 }
 0x2ee   : > { %v1433_v24 = vpop.f32.mrf.mxu0 }
 0x2ef   : > { %v1457_v30 = vadd.f32 %v1456_v28, %v1433_v24 }
 0x2f1   : > { %v1603_v2 = vpop.permute.xlu1 %1602  ;;  %v1466_v23 = vpack.c.bf16 %v1457_v30, %v1457_v30 }
 0x2f9   : > { %v1495_v42 = vpop.permute.xlu1 %1494 }
 0x2fa   : > { %v1624_v3 = vsel %vm1621_vm3, %v1478_v25, %v1495_v42  ;;  %v1616_v25 = vunpack.c.l.b16 %v1466_v23  ;;  %v1547_v42 = vunpack.c.l.b16 %v1107_v4 }
 0x2fb   : > { %v1633_v8 = vsel %vm1631_vm2, %v1624_v3, %v1514_v46  ;;  %v1605_v46 = vpop.permute.xlu2 %1604 }
 0x2fc   : > { %v1640_v32 = vsel %vm1638_vm4, %v1633_v8, %v1533_v14  ;;  %v1619_v31 = vpack.c.b16 %v1616_v25, %v1615_v22  ;;  %v1550_v1 = vpack.c.b16 %v1547_v42, %v1547_v42  ;;  %v3090_v42 = vld [vmem:[%s4476_s6 + $0x2] sm:$0x3] }
 0x2fd   : > { %1837 = vmatmul.bf16.vlgmr.msrb.gmra.mxu1 %v1640_v32 }
 0x2fe   : > { %3087 = vmatmul.msk.bf16.gmra.mxu0 %vm1621_vm3, %v1619_v31  ;;  %v3462_v31 = vld [vmem:[%s4475_s5] ss:$0 sm:$0xff] }
 0x300   : > { %v1436_v55 = vpop.f32.mrf.mxu0 }
 0x303   : > { %v1535_v63 = vpop.permute.xlu2 %1534 }
 0x304   : > { %v1459_v52 = vpop.f32.mrf.mxu2 }
 0x305   : > { %v1460_v59 = vadd.f32 %v1459_v52, %v1436_v55 }
 0x307   : > { %v1467_v37 = vpack.c.bf16 %v1460_v59, %v1460_v59 }
 0x308   : > { %v1438_v57 = vpop.f32.mrf.mxu0 }
 0x309   : > { %v1617_v54 = vunpack.c.l.b16 %v1467_v37 }
 0x30b   : > { %v1620_v27 = vpack.c.b16 %v1617_v54, %v1617_v54  ;;  %v1607_v14 = vpop.permute.xlu2 %1606 }
 0x30c   : > { %v1461_v48 = vpop.f32.mrf.mxu2 }
 0x30e   : > { %3088 = vmatmul.msk.bf16.gmra.mxu0 %vm1621_vm3, %v1620_v27 }
 0x313   : > { %v1537_v20 = vpop.permute.xlu2 %1536 }
 0x31d   : > { %v1584_v49 = vpop.permute.xlu0 %1583 }
 0x31e   : > { %v1658_v38 = vsel %vm1631_vm2, %v1650_v26, %v1584_v49 }
 0x31f   : > { %v1664_v51 = vsel %vm1638_vm4, %v1658_v38, %v1603_v2 }
 0x320   : > { %1860 = vmatmul.bf16.vlgmr.msrb.gmra.mxu3 %v1664_v51 }
 0x325   : > { %v1567_v19 = vpop.permute.xlu0 %1566 }
 0x326   : > { %v1653_v2 = vsel %vm1621_vm3, %v1549_v21, %v1567_v19 }
 0x32d   : > { %v1586_v56 = vpop.permute.xlu1 %1585  ;;  %v1497_v39 = vpop.permute.xlu0 %1496 }
 0x32e   : > { %v1660_v61 = vsel %vm1631_vm2, %v1653_v2, %v1586_v56  ;;  %v1627_v36 = vsel %vm1621_vm3, %v1479_v50, %v1497_v39 }
 0x32f   : > { %v1667_v41 = vsel %vm1638_vm4, %v1660_v61, %v1605_v46 }
 0x330   : > { %1865 = vmatmul.bf16.gmra.mxu3 %v1667_v41 }
 0x335   : > { %v1516_v13 = vpop.permute.xlu1 %1515  ;;  %v1569_v3 = vpop.permute.xlu0 %1568 }
 0x336   : > { %v1635_v15 = vsel %vm1631_vm2, %v1627_v36, %v1516_v13  ;;  %v1656_v8 = vsel %vm1621_vm3, %v1550_v1, %v1569_v3  ;;  %v1906_v36 = vld [vmem:[%s4476_s6] sm:$0x3]  ;;  %v3094_v13 = vld [vmem:[%s4476_s6 + $0x6] sm:$0x3]  ;;  %v3092_v3 = vld [vmem:[%s4476_s6 + $0x4] sm:$0x3] }
 0x337   : > { %v1643_v7 = vsel %vm1638_vm4, %v1635_v15, %v1535_v63  ;;  %v3102_v15 = vld [vmem:[%s4476_s6 + $0xe] sm:$0x3]  ;;  %v3104_v1 = vld [vmem:[%s4476_s6 + $0x10] sm:$0x3] }
 0x338   : > { %1842 = vmatmul.bf16.gmra.mxu1 %v1643_v7  ;;  %v3098_v7 = vld [vmem:[%s4476_s6 + $0xa] sm:$0x3] }
 0x33d   : > { %v1588_v43 = vpop.permute.xlu1 %1587  ;;  %v1499_v32 = vpop.permute.xlu0 %1498 }
 0x33e   : > { %v1662_v45 = vsel %vm1631_vm2, %v1656_v8, %v1588_v43  ;;  %v1630_v18 = vsel %vm1621_vm3, %v1480_v0, %v1499_v32 }
 0x33f   : > { %v1670_v50 = vsel %vm1638_vm4, %v1662_v45, %v1607_v14  ;;  %v3100_v14 = vld [vmem:[%s4476_s6 + $0xc] sm:$0x3] }
 0x340   : > { %1870 = vmatmul.bf16.gmra.mxu3 %v1670_v50 }
 0x345   : > { %v1518_v17 = vpop.permute.xlu1 %1517 }
 0x346   : > { %v1637_v24 = vsel %vm1631_vm2, %v1630_v18, %v1518_v17  ;;  %v3399_v18 = vld [vmem:[%s4477_s7 + $0x38] sm:$0xff] }
 0x347   : > { %v1646_v58 = vsel %vm1638_vm4, %v1637_v24, %v1537_v20  ;;  %v3407_v17 = vld [vmem:[%s4477_s7 + $0x78] sm:$0xff]  ;;  %v3398_v20 = vld [vmem:[%s4477_s7 + $0x30] sm:$0xff] }
 0x348   : > { %1847 = vmatmul.bf16.gmra.mxu1 %v1646_v58  ;;  %v3415_v24 = vld [vmem:[%s4477_s7 + $0xb8] sm:$0xff]  ;;  %v3406_v58 = vld [vmem:[%s4477_s7 + $0x70] sm:$0xff] }
 0x364   : > { %v1884_v28 = vpop.f32.mrf.mxu0 }
 0x36c   : > { %v1886_v30 = vpop.f32.mrf.mxu0 }
 0x37a   : > { %v1838_v25 = vpop.f32.mrf.mxu1 }
 0x37b   : > { %v1889_v22 = vpop.f32.mrf.mxu0  ;;  %v1839_v33 = vadd.f32 %v3462_v31, %v1838_v25  ;;  %v3405_v25 = vld [vmem:[%s4477_s7 + $0x68] sm:$0xff] }
 0x382   : > { %v1840_v5 = vpop.f32.mrf.mxu1 }
 0x383   : > { %v1891_v23 = vpop.f32.mrf.mxu0  ;;  %v1841_v53 = vadd.f32 %v3462_v31, %v1840_v5  ;;  %v3396_v5 = vld [vmem:[%s4477_s7 + $0x20] sm:$0xff] }
 0x38b   : > { %v1894_v34 = vpop.f32.mrf.mxu0 }
 0x393   : > { %v1896_v49 = vpop.f32.mrf.mxu0 }
 0x394   : > { %v3395_v49 = vld [vmem:[%s4477_s7 + $0x18] sm:$0xff] }
 0x3a3   : > { %v1861_v16 = vpop.f32.mrf.mxu3 }
 0x3a4   : > { %v1862_v9 = vadd.f32 %v1861_v16, %v1839_v33 }
 0x3a6   : > { %v1885_v44 = vadd.f32 %v1884_v28, %v1862_v9  ;;  %v3414_v28 = vld [vmem:[%s4477_s7 + $0xb0] sm:$0xff] }
 0x3a8   : > { %v1898_v38 = vmax.f32 %v1885_v44, 0.0  ;;  %v3412_v44 = vld [vmem:[%s4477_s7 + $0xa0] sm:$0xff] }
 0x3ab   : > { %v1863_v29 = vpop.f32.mrf.mxu3 }
 0x3ac   : > { %v1864_v26 = vadd.f32 %v1863_v29, %v1841_v53  ;;  %v3404_v29 = vld [vmem:[%s4477_s7 + $0x60] sm:$0xff] }
 0x3ae   : > { %v1887_v55 = vadd.f32 %v1886_v30, %v1864_v26  ;;  %v3423_v30 = vld [vmem:[%s4477_s7 + $0xf8] sm:$0xff] }
 0x3b0   : > { %v1899_v52 = vmax.f32 %v1887_v55, 0.0 }
 0x3b2   : > { %v1903_v11 = vpack.c.bf16 %v1899_v52, %v1898_v38  ;;  %v3403_v52 = vld [vmem:[%s4477_s7 + $0x58] sm:$0xff] }
 0x3b3   : > { %v1866_v51 = vpop.f32.mrf.mxu3 }
 0x3b5   : > { %v1843_v59 = vpop.f32.mrf.mxu1 }
 0x3b6   : > { %v1844_v35 = vadd.f32 %v3462_v31, %v1843_v59 }
 0x3b8   : > { %v1867_v60 = vadd.f32 %v1866_v51, %v1844_v35  ;;  %v3394_v51 = vld [vmem:[%s4477_s7 + $0x10] sm:$0xff]  ;;  %v3392_v35 = vld [vmem:[%s4477_s7] sm:$0xff] }
 0x3ba   : > { %v1890_v56 = vadd.f32 %v1889_v22, %v1867_v60  ;;  %v3397_v22 = vld [vmem:[%s4477_s7 + $0x28] sm:$0xff]  ;;  %v3400_v60 = vld [vmem:[%s4477_s7 + $0x40] sm:$0xff] }
 0x3bb   : > { %v1868_v47 = vpop.f32.mrf.mxu3 }
 0x3bc   : > { %v1900_v63 = vmax.f32 %v1890_v56, 0.0 }
 0x3bd   : > { %v1845_v37 = vpop.f32.mrf.mxu1 }
 0x3be   : > { %v1846_v40 = vadd.f32 %v3462_v31, %v1845_v37  ;;  %v3393_v37 = vld [vmem:[%s4477_s7 + $0x8] sm:$0xff] }
 0x3c0   : > { %v1869_v57 = vadd.f32 %v1868_v47, %v1846_v40  ;;  %v3402_v47 = vld [vmem:[%s4477_s7 + $0x50] sm:$0xff] }
 0x3c2   : > { %v1892_v6 = vadd.f32 %v1891_v23, %v1869_v57 }
 0x3c3   : > { %v1871_v54 = vpop.f32.mrf.mxu3 }
 0x3c4   : > { %v1901_v62 = vmax.f32 %v1892_v6, 0.0 }
 0x3c5   : > { %v1848_v19 = vpop.f32.mrf.mxu1 }
 0x3c6   : > { %v1849_v27 = vadd.f32 %v3462_v31, %v1848_v19  ;;  %v1904_v4 = vpack.c.bf16 %v1901_v62, %v1900_v63  ;;  %v3422_v31 = vld [vmem:[%s4477_s7 + $0xf0] sm:$0xff]  ;;  %v3420_v62 = vld [vmem:[%s4477_s7 + $0xe0] sm:$0xff]  ;;  %v3427_v63 = vld [vmem:[%s4477_s7 + $0x118] sm:$0xff] }
 0x3c8   : > { %v1872_v48 = vadd.f32 %v1871_v54, %v1849_v27 }
 0x3ca   : > { %v1895_v46 = vadd.f32 %v1894_v34, %v1872_v48  ;;  %v3413_v34 = vld [vmem:[%s4477_s7 + $0xa8] sm:$0xff] }
 0x3cb   : > { %v1873_v21 = vpop.f32.mrf.mxu3  ;;  %v3401_v48 = vld [vmem:[%s4477_s7 + $0x48] sm:$0xff] }
 0x3cc   : > { %v1902_v2 = vmax.f32 %v1895_v46, 0.0 }
 0x3cd   : > { %v1850_v39 = vpop.f32.mrf.mxu1 }
 0x3ce   : > { %v1905_v61 = vpack.c.bf16 %v1902_v2, %v1902_v2  ;;  %v3421_v39 = vld [vmem:[%s4477_s7 + $0xe8] sm:$0xff] }
 0x3d0   : > { %v1913_v41 = vsel %vm1911_vm5, %v1905_v61, 0 }
 0x3d1   : > { %1920 = vmatpush.bf16.msrb.mxu2 %v1913_v41  ;;  %1958 = vmatpush.bf16.msra.mxu1 %v1913_v41 }
 0x3d2   : > { %1977 = vmatpush.bf16.msra.mxu3 %v1913_v41  ;;  %1996 = vmatpush.bf16.msra.mxu0 %v1913_v41 }
 0x3d5   : > { %1921 = vmatpush.bf16.msrb.mxu2 %v1904_v4  ;;  %1959 = vmatpush.bf16.msra.mxu1 %v1904_v4 }
 0x3d6   : > { %1978 = vmatpush.bf16.msra.mxu3 %v1904_v4  ;;  %1997 = vmatpush.bf16.msra.mxu0 %v1904_v4 }
 0x3d9   : > { %1922 = vmatpush.bf16.msrb.mxu2 %v1903_v11  ;;  %1960 = vmatpush.bf16.msra.mxu1 %v1903_v11 }
 0x3da   : > { %1979 = vmatpush.bf16.msra.mxu3 %v1903_v11  ;;  %1998 = vmatpush.bf16.msra.mxu0 %v1903_v11 }
 0x3dc   : > { %3089 = vmatmul.msk.bf16.vlgmr.msrb.gmra.mxu2 %vm1907_vm6, %v1906_v36  ;;  %3093 = vmatmul.msk.bf16.vlgmr.msra.gmra.mxu1 %vm1907_vm6, %v3092_v3  ;;  %v3410_v36 = vld [vmem:[%s4477_s7 + $0x90] sm:$0xff]  ;;  %v3425_v3 = vld [vmem:[%s4477_s7 + $0x108] sm:$0xff] }
 0x3dd   : > { %1939 = vmatpush.bf16.msra.mxu2 %v1913_v41  ;;  %2034 = vmatpush.bf16.msrb.mxu1 %v1913_v41 }
 0x3de   : > { %2053 = vmatpush.bf16.msrb.mxu3 %v1913_v41  ;;  %2072 = vmatpush.bf16.msrb.mxu0 %v1913_v41 }
 0x3df   : > { %3095 = vmatmul.msk.bf16.vlgmr.msra.gmra.mxu3 %vm1907_vm6, %v3094_v13  ;;  %3097 = vmatmul.msk.bf16.vlgmr.msra.gmra.mxu0 %vm1907_vm6, %v3096_v10  ;;  %v3417_v10 = vld [vmem:[%s4477_s7 + $0xc8] sm:$0xff] }
 0x3e1   : > { %1940 = vmatpush.bf16.msra.mxu2 %v1904_v4  ;;  %2035 = vmatpush.bf16.msrb.mxu1 %v1904_v4 }
 0x3e2   : > { %2054 = vmatpush.bf16.msrb.mxu3 %v1904_v4  ;;  %2073 = vmatpush.bf16.msrb.mxu0 %v1904_v4 }
 0x3e5   : > { %1941 = vmatpush.bf16.msra.mxu2 %v1903_v11  ;;  %2036 = vmatpush.bf16.msrb.mxu1 %v1903_v11 }
 0x3e6   : > { %2055 = vmatpush.bf16.msrb.mxu3 %v1903_v11  ;;  %2074 = vmatpush.bf16.msrb.mxu0 %v1903_v11 }
 0x3e9   : > { %2015 = vmatpush.bf16.msrb.mxu2 %v1913_v41  ;;  %2425 = vmatpush.bf16.msra.mxu1 %v3407_v17  ;;  %v3411_v41 = vld [vmem:[%s4477_s7 + $0x98] sm:$0xff] }
 0x3ea   : > { %2438 = vmatpush.bf16.msra.mxu3 %v3415_v24  ;;  %2451 = vmatpush.bf16.msra.mxu0 %v3423_v30 }
 0x3ec   : > { %3091 = vmatmul.msk.bf16.vlgmr.msra.gmra.mxu2 %vm1907_vm6, %v3090_v42  ;;  %3101 = vmatmul.msk.bf16.vlgmr.msrb.gmra.mxu1 %vm1907_vm6, %v3100_v14  ;;  %v3418_v42 = vld [vmem:[%s4477_s7 + $0xd0] sm:$0xff] }
 0x3ed   : > { %2016 = vmatpush.bf16.msrb.mxu2 %v1904_v4  ;;  %2426 = vmatpush.bf16.msra.mxu1 %v3406_v58  ;;  %v3419_v4 = vld [vmem:[%s4477_s7 + $0xd8] sm:$0xff] }
 0x3ee   : > { %2439 = vmatpush.bf16.msra.mxu3 %v3414_v28  ;;  %2452 = vmatpush.bf16.msra.mxu0 %v3422_v31 }
 0x3ef   : > { %3103 = vmatmul.msk.bf16.vlgmr.msrb.gmra.mxu3 %vm1907_vm6, %v3102_v15  ;;  %3105 = vmatmul.msk.bf16.vlgmr.msrb.gmra.mxu0 %vm1907_vm6, %v3104_v1  ;;  %v3426_v15 = vld [vmem:[%s4477_s7 + $0x110] sm:$0xff]  ;;  %v3408_v1 = vld [vmem:[%s4477_s7 + $0x80] sm:$0xff] }
 0x3f1   : > { %2017 = vmatpush.bf16.msrb.mxu2 %v1903_v11  ;;  %2427 = vmatpush.bf16.msra.mxu1 %v3405_v25 }
 0x3f2   : > { %2440 = vmatpush.bf16.msra.mxu3 %v3413_v34  ;;  %2453 = vmatpush.bf16.msra.mxu0 %v3421_v39  ;;  %v3443_v34 = vld [vmem:[%s4479_s9 + $0x78] sm:$0xff]  ;;  %v3436_v39 = vld [vmem:[%s4479_s9 + $0x40] sm:$0xff] }
 0x3f5   : > { %2412 = vmatpush.bf16.msra.mxu2 %v3399_v18  ;;  %2428 = vmatpush.bf16.msra.mxu1 %v3404_v29  ;;  %v3463_v29 = vld [vmem:[%s4478_s8] ss:$0 sm:$0xff] }
 0x3f6   : > { %2441 = vmatpush.bf16.msra.mxu3 %v3412_v44  ;;  %2454 = vmatpush.bf16.msra.mxu0 %v3420_v62 }
 0x3f9   : > { %2413 = vmatpush.bf16.msra.mxu2 %v3398_v20  ;;  %2429 = vmatpush.bf16.msra.mxu1 %v3403_v52 }
 0x3fa   : > { %2442 = vmatpush.bf16.msra.mxu3 %v3411_v41  ;;  %2455 = vmatpush.bf16.msra.mxu0 %v3419_v4 }
 0x3fc   : > { %3099 = vmatmul.msk.bf16.vlgmr.msrb.gmra.mxu2 %vm1907_vm6, %v3098_v7  ;;  %v3409_v7 = vld [vmem:[%s4477_s7 + $0x88] sm:$0xff] }
 0x3fd   : > { %2414 = vmatpush.bf16.msra.mxu2 %v3397_v22  ;;  %2430 = vmatpush.bf16.msra.mxu1 %v3402_v47  ;;  %v3429_v47 = vld [vmem:[%s4479_s9 + $0x8] sm:$0xff] }
 0x3fe   : > { %2443 = vmatpush.bf16.msra.mxu3 %v3410_v36  ;;  %2456 = vmatpush.bf16.msra.mxu0 %v3418_v42 }
 0x401   : > { %2415 = vmatpush.bf16.msra.mxu2 %v3396_v5  ;;  %2431 = vmatpush.bf16.msra.mxu1 %v3401_v48  ;;  %v3433_v5 = vld [vmem:[%s4479_s9 + $0x28] sm:$0xff]  ;;  %v3428_v48 = vld [vmem:[%s4479_s9] sm:$0xff] }
 0x402   : > { %2444 = vmatpush.bf16.msra.mxu3 %v3409_v7  ;;  %2457 = vmatpush.bf16.msra.mxu0 %v3417_v10  ;;  %v3444_v7 = vld [vmem:[%s4481_s11] sm:$0xff] }
 0x403   : > { %v2525_v10 = vld [vmem:[%s4480_s10] sm:$0x1] }
 0x405   : > { %2416 = vmatpush.bf16.msra.mxu2 %v3395_v49  ;;  %2432 = vmatpush.bf16.msra.mxu1 %v3400_v60  ;;  %v3442_v60 = vld [vmem:[%s4479_s9 + $0x70] sm:$0xff] }
 0x406   : > { %2445 = vmatpush.bf16.msra.mxu3 %v3408_v1 }
 0x409   : > { %2417 = vmatpush.bf16.msra.mxu2 %v3394_v51 }
 0x40a   : > { %2635 = vmatpush.bf16.msrb.mxu3 %v3443_v34 }
 0x40d   : > { %2418 = vmatpush.bf16.msra.mxu2 %v3393_v37 }
 0x40e   : > { %2636 = vmatpush.bf16.msrb.mxu3 %v3442_v60 }
 0x411   : > { %2419 = vmatpush.bf16.msra.mxu2 %v3392_v35 }
 0x415   : > { %2468 = vmatpush.bf16.msrb.mxu2 %v3427_v63 }
 0x419   : > { %2469 = vmatpush.bf16.msrb.mxu2 %v3426_v15  ;;  %v3445_v15 = vld [vmem:[%s4481_s11 + $0x8] sm:$0xff] }
 0x41d   : > { %2470 = vmatpush.bf16.msrb.mxu2 %v3425_v3 }
 0x459   : > { %v1962_v46 = vpop.f32.mrf.mxu1 }
 0x45a   : > { %v1966_v21 = vpack.c.bf16 %v1962_v46, %v1962_v46  ;;  %v3441_v46 = vld [vmem:[%s4479_s9 + $0x68] sm:$0xff] }
 0x45b   : > { %2637 = vmatpush.bf16.msrb.mxu3 %v3441_v46 }
 0x45c   : > { %v2000_v61 = vpop.f32.mrf.mxu0 }
 0x45d   : > { %v2004_v30 = vpack.c.bf16 %v2000_v61, %v2000_v61 }
 0x45f   : > { %v4272_v8 = vpop.f32.mrf.mxu2 }
 0x461   : > { %v1964_v6 = vpop.f32.mrf.mxu1 }
 0x462   : > { %v1981_v43 = vpop.f32.mrf.mxu3  ;;  %v3440_v6 = vld [vmem:[%s4479_s9 + $0x60] sm:$0xff] }
 0x463   : > { %v1985_v45 = vpack.c.bf16 %v1981_v43, %v1981_v43  ;;  %v3424_v43 = vld [vmem:[%s4477_s7 + $0x100] sm:$0xff]  ;;  %2638 = vmatpush.bf16.msrb.mxu3 %v3440_v6 }
 0x464   : > { %v2002_v13 = vpop.f32.mrf.mxu0  ;;  %2471 = vmatpush.bf16.msrb.mxu2 %v3424_v43 }
 0x465   : > { %v2087_v12 = vunpack.c.l.b16 %v1985_v45  ;;  %v3416_v45 = vld [vmem:[%s4477_s7 + $0xc0] sm:$0xff] }
 0x466   : > { %2458 = vmatpush.bf16.msra.mxu0 %v3416_v45 }
 0x467   : > { %v2088_v50 = vpack.c.b16 %v2087_v12, %v2087_v12  ;;  %v1926_v32 = vpop.f32.mrf.mxu2 }
 0x469   : > { %2089 = vrot.lane.b32.xlu2 %v2088_v50, %s3472_s18  ;;  %v2038_v12 = vpop.f32.mrf.mxu1 }
 0x46a   : > { %v1983_v0 = vpop.f32.mrf.mxu3  ;;  %v2042_v20 = vpack.c.bf16 %v2038_v12, %v2038_v12  ;;  %2676 = vmatpush.bf16.msrb.mxu0 %v3445_v15 }
 0x46b   : > { %v1928_v0 = vpack.c.bf16 %v4272_v8, %v4272_v8  ;;  %v3435_v8 = vld [vmem:[%s4479_s9 + $0x38] sm:$0xff] }
 0x46c   : > { %v2076_v14 = vpop.f32.mrf.mxu0  ;;  %2622 = vmatpush.bf16.msrb.mxu1 %v3435_v8 }
 0x46d   : > { %v2080_v28 = vpack.c.bf16 %v2076_v14, %v2076_v14 }
 0x46e   : > { %2677 = vmatpush.bf16.msrb.mxu0 %v3444_v7 }
 0x46f   : > { %v1943_v16 = vpop.f32.mrf.mxu2 }
 0x470   : > { %v1947_v33 = vpack.c.bf16 %v1943_v16, %v1943_v16  ;;  %v3434_v16 = vld [vmem:[%s4479_s9 + $0x30] sm:$0xff] }
 0x471   : > { %v2040_v32 = vpop.f32.mrf.mxu1  ;;  %2623 = vmatpush.bf16.msrb.mxu1 %v3434_v16 }
 0x472   : > { %v2057_v23 = vpop.f32.mrf.mxu3  ;;  %v2082_v9 = vunpack.c.l.b16 %v1947_v33  ;;  %v2654_v32 = vld [vmem:[%s4482_s12] sm:$0x1] }
 0x473   : > { %v2061_v53 = vpack.c.bf16 %v2057_v23, %v2057_v23 }
 0x474   : > { %v2083_v26 = vpack.c.b16 %v2082_v9, %v2082_v9  ;;  %v2078_v50 = vpop.f32.mrf.mxu0 }
 0x475   : > { %v2097_v55 = vunpack.c.l.b16 %v2061_v53  ;;  %2624 = vmatpush.bf16.msrb.mxu1 %v3433_v5  ;;  %v3432_v53 = vld [vmem:[%s4479_s9 + $0x20] sm:$0xff] }
 0x476   : > { %2084 = vrot.lane.b32.xlu0 %v2083_v26, %s3472_s18  ;;  %v3431_v26 = vld [vmem:[%s4479_s9 + $0x18] sm:$0xff] }
 0x477   : > { %v1945_v11 = vpop.f32.mrf.mxu2  ;;  %v2098_v59 = vpack.c.b16 %v2097_v55, %v2097_v55 }
 0x479   : > { %2625 = vmatpush.bf16.msrb.mxu1 %v3432_v53 }
 0x47a   : > { %v2059_v38 = vpop.f32.mrf.mxu3 }
 0x47b   : > { %v3430_v38 = vld [vmem:[%s4479_s9 + $0x10] sm:$0xff] }
 0x47d   : > { %2626 = vmatpush.bf16.msrb.mxu1 %v3431_v26 }
 0x47e   : > { %2099 = vrot.lane.b32.xlu0 %v2098_v59, %s3472_s18 }
 0x47f   : > { %v2019_v40 = vpop.f32.mrf.mxu2 }
 0x480   : > { %v2023_v54 = vpack.c.bf16 %v2019_v40, %v2019_v40 }
 0x481   : > { %2627 = vmatpush.bf16.msrb.mxu1 %v3430_v38 }
 0x482   : > { %v2092_v19 = vunpack.c.l.b16 %v2023_v54 }
 0x484   : > { %v2093_v27 = vpack.c.b16 %v2092_v19, %v2092_v19 }
 0x485   : > { %2628 = vmatpush.bf16.msrb.mxu1 %v3429_v47 }
 0x486   : > { %2094 = vrot.lane.b32.xlu1 %v2093_v27, %s3472_s18 }
 0x487   : > { %v2021_v57 = vpop.f32.mrf.mxu2 }
 0x489   : > { %2629 = vmatpush.bf16.msrb.mxu1 %v3428_v48 }
 0x4c3   : > { %v2090_v2 = vpop.permute.xlu2 %2089 }
 0x4c4   : > { %v2107_v56 = vsel %vm1631_vm2, %v1966_v21, %v2090_v2  ;;  %v3439_v21 = vld [vmem:[%s4479_s9 + $0x58] sm:$0xff]  ;;  %v3438_v2 = vld [vmem:[%s4479_s9 + $0x50] sm:$0xff] }
 0x4c5   : > { %2433 = vmatmul.bf16.vlgmr.msra.gmra.mxu1 %v2107_v56  ;;  %2639 = vmatpush.bf16.msrb.mxu3 %v3439_v21  ;;  %v3437_v56 = vld [vmem:[%s4479_s9 + $0x48] sm:$0xff] }
 0x4c9   : > { %2640 = vmatpush.bf16.msrb.mxu3 %v3438_v2 }
 0x4cd   : > { %2641 = vmatpush.bf16.msrb.mxu3 %v3437_v56 }
 0x4d1   : > { %2642 = vmatpush.bf16.msrb.mxu3 %v3436_v39 }
 0x4e8   : > { %v2085_v18 = vpop.permute.xlu0 %2084 }
 0x4e9   : > { %v2103_v17 = vsel %vm1631_vm2, %v1928_v0, %v2085_v18 }
 0x4ea   : > { %2420 = vmatmul.bf16.vlgmr.msra.gmra.mxu2 %v2103_v17 }
 0x4f0   : > { %v2100_v24 = vpop.permute.xlu0 %2099 }
 0x4f1   : > { %v2115_v58 = vsel %vm1631_vm2, %v2042_v20, %v2100_v24 }
 0x4f2   : > { %2459 = vmatmul.bf16.vlgmr.msra.gmra.mxu0 %v2115_v58 }
 0x4f8   : > { %v2095_v22 = vpop.permute.xlu1 %2094 }
 0x4f9   : > { %v2111_v23 = vsel %vm1631_vm2, %v2004_v30, %v2095_v22 }
 0x4fa   : > { %2446 = vmatmul.bf16.vlgmr.msra.gmra.mxu3 %v2111_v23  ;;  %3250 = vmatmul.msk.bf16.vlgmr.msrb.gmra.mxu2 %vm1631_vm2, %v2080_v28 }
 0x542   : > { %v2434_v25 = vpop.f32.mrf.mxu1 }
 0x54a   : > { %v2436_v31 = vpop.f32.mrf.mxu1 }
 0x56d   : > { %v2421_v33 = vpop.f32.mrf.mxu2 }
 0x56e   : > { %v2422_v55 = vadd.f32 %v3463_v29, %v2421_v33 }
 0x56f   : > { %v2460_v9 = vpop.f32.mrf.mxu0 }
 0x570   : > { %v2435_v52 = vadd.f32 %v2434_v25, %v2422_v55 }
 0x575   : > { %v2423_v44 = vpop.f32.mrf.mxu2 }
 0x577   : > { %v2462_v49 = vpop.f32.mrf.mxu0 }
 0x57d   : > { %v2447_v11 = vpop.f32.mrf.mxu3  ;;  %v2473_v51 = vpop.f32.mrf.mxu2 }
 0x57e   : > { %v2448_v59 = vadd.f32 %v2447_v11, %v2435_v52 }
 0x580   : > { %v2461_v37 = vadd.f32 %v2460_v9, %v2448_v59 }
 0x582   : > { %v2474_v40 = vadd.f32 %v2473_v51, %v2461_v37 }
 0x584   : > { %v2477_v54 = vmax.f32 %v2474_v40, 0.0 }
 0x585   : > { %v2449_v35 = vpop.f32.mrf.mxu3  ;;  %v2475_v19 = vpop.f32.mrf.mxu2 }
 0x586   : > { %v2485_v27 = vrot.slane %v2477_v54, 3  ;;  %v2479_v57 = vrot.slane %v2477_v54, 1  ;;  %v2483_v63 = vrot.slane %v2477_v54, 2 }
 0x588   : > { %2486 = vrot.lane.b32.xlu1 %v2485_v27, %s3472_s18  ;;  %2480 = vrot.lane.b32.xlu2 %v2479_v57, %s3472_s18 }
 0x5e2   : > { %v2481_v61 = vpop.permute.xlu2 %2480 }
 0x5e3   : > { %v2489_v62 = vsel %vm1631_vm2, %v2477_v54, %v2481_v61 }
 0x5e4   : > { %v2491_v41 = vpack.c.bf16 %v2489_v62, %v2489_v62 }
 0x5e6   : > { %2630 = vmatmul.bf16.vlgmr.msrb.gmra.mxu1 %v2491_v41 }
 0x5fa   : > { %v2487_v4 = vpop.permute.xlu1 %2486 }
 0x5fb   : > { %v2490_v36 = vsel %vm1631_vm2, %v2483_v63, %v2487_v4 }
 0x5fc   : > { %v2492_v13 = vpack.c.bf16 %v2490_v36, %v2490_v36 }
 0x5fe   : > { %2643 = vmatmul.bf16.vlgmr.msrb.gmra.mxu3 %v2492_v13 }
 0x663   : > { %v2631_v42 = vpop.f32.mrf.mxu1 }
 0x664   : > { %v2632_v1 = vadd.f32 %v2631_v42, %v2525_v10 }
 0x66b   : > { %v2633_v3 = vpop.f32.mrf.mxu1 }
 0x681   : > { %v2644_v14 = vpop.f32.mrf.mxu3 }
 0x682   : > { %v2645_v43 = vadd.f32 %v2644_v14, %v2632_v1 }
 0x684   : > { %v2648_v45 = vmax.f32 %v2645_v43, 0.0 }
 0x686   : > { %v2649_v12 = vpack.c.bf16 %v2648_v45, %v2648_v45 }
 0x688   : > { %3323 = vmatmul.msk.bf16.vlgmr.msrb.gmra.mxu0 %vm1621_vm3, %v2649_v12 }
 0x689   : > { %v2646_v50 = vpop.f32.mrf.mxu3 }
 0x705   : > { %v2679_v0 = vpop.f32.mrf.mxu0 }
 0x706   : > { %v2680_v18 = vadd.f32 %v2679_v0, %v2654_v32 }
 0x708   : > { %2684 = vrot.lane.b32.xlu0 %v2680_v18, %s3474_s15 }
 0x70d   : > { %v2681_v17 = vpop.f32.mrf.mxu0 }
 0x77a   : > { %v2685_v20 = vpop.permute.xlu0 %2684 }
 0x77b   : > { %v2687_v24 = vsel %vm1621_vm3, %v2648_v45, %v2685_v20 }
 0x77c   : > { %v2689_v58 = vsel %vm2688_vm7, %v2687_v24, 0.0 }
 0x77d   : > { %2690 = vst [vmem:[%s436_s23] sm:$0x1] %v2689_v58 }
 0x77e PF: > { %s23_s25 = sadd.s32 1, %s3470_s25  }
 0x77f   : > { %p20_p4 = scmp.ge.s32.totalorder %s23_s25, 4  }
 0x781   :  { %22 = sbr.rel (!%p20_p4) target bundleno = 1 (0x1), region = 118 }

</bundles_post_ra>
